<compile_context>
chip_gen: v5e
topology: v5e:2x2
jax: 0.10.0
libtpu: 0.0.40
codegen_flags: <defaults>
</compile_context>

<pallas_src>
import functools

import jax
import jax.numpy as jnp
from jax.experimental import pallas as pl
from jax.experimental.pallas import tpu as pltpu

EPS = 1e-3  # BatchNorm2d eps


def _fused_kernel(x_ref, scale_ref, w_ref, gamma_ref, beta_ref, o_ref, *, inv_p):
    # x_ref:     [Cin, P]    (native dtype, typically f32)  NCHW activations, N == 1
    # scale_ref: [1, Cin]    (native dtype)                 per-channel multiplier (x285)
    # w_ref:     [Cout, Cin] bf16                           1x1 conv weight (HBM-resident bf16)
    # gamma_ref: [Cout, 1]   f32                            BN affine weight
    # beta_ref:  [Cout, 1]   f32                            BN affine bias
    # o_ref:     [Cout, P]   f32
    #
    # Fold the per-Cin scale into the weight (bf16 * f32 -> f32 promote; smaller temp
    # than scaling x, fewer VPU multiplies).  Matmul runs in f32 with f32 accumulation:
    # MXU time is fully hidden under DMA, so we keep full activation precision.
    w_s = (w_ref[...] * scale_ref[...]).astype(jnp.float32)         # [Cout, Cin] f32
    x_f = x_ref[...].astype(jnp.float32)                            # no-op when x is f32
    y = jnp.dot(w_s, x_f, preferred_element_type=jnp.float32)       # [Cout, P] f32

    # One-pass BatchNorm stats (training mode: biased batch stats per out-channel).
    s = jnp.sum(y, axis=1, keepdims=True)                            # [Cout, 1]
    sq = jnp.sum(y * y, axis=1, keepdims=True)                       # [Cout, 1]
    mean = s * inv_p
    var = jnp.maximum(sq * inv_p - mean * mean, 0.0)                 # clamp cancellation
    a = gamma_ref[...] * jax.lax.rsqrt(var + EPS)                    # folded scale
    b = beta_ref[...] - mean * a                                     # folded shift
    o_ref[...] = y * a + b                                           # 1 mul + 1 add / elem


def mul_conv_bn(x280, x285, conv_w_2d, bn_gamma, bn_beta):
    """x280: [N, Cin, H, W], x285: [N, Cin, 1, 1], conv_w_2d: [Cout, Cin] (bf16 preferred).

    Returns the BatchNorm'd activation in NCHW (f32), matching the PyTorch forward.
    No dtype casts are forced here: weights should already be bf16 (one-time cast at
    parameter init); activations keep their producer dtype.
    """
    N, Cin, H, W = x280.shape
    Cout = conv_w_2d.shape[0]
    assert N == 1, "per-channel scale folding into the weight assumes N == 1"
    P = N * H * W

    # Metadata-only reshapes (no transposes, no dtype casts).
    x = x280.reshape(Cin, P)                  # [Cin, P]
    scale = x285.reshape(1, Cin)              # [1, Cin]
    gamma = bn_gamma.reshape(Cout, 1)         # [Cout, 1]
    beta = bn_beta.reshape(Cout, 1)           # [Cout, 1]

    bytes_accessed = (
        x.size * x.dtype.itemsize
        + scale.size * scale.dtype.itemsize
        + conv_w_2d.size * conv_w_2d.dtype.itemsize
        + gamma.size * gamma.dtype.itemsize
        + beta.size * beta.dtype.itemsize
        + Cout * P * 4  # f32 output
    )

    kernel = functools.partial(_fused_kernel, inv_p=1.0 / float(P))
    vmem = pl.BlockSpec(memory_space=pltpu.MemorySpace.VMEM)
    out = pl.pallas_call(
        kernel,
        out_shape=jax.ShapeDtypeStruct((Cout, P), jnp.float32),
        in_specs=[vmem, vmem, vmem, vmem, vmem],
        out_specs=vmem,
        cost_estimate=pl.CostEstimate(
            flops=2 * Cout * Cin * P,
            bytes_accessed=bytes_accessed,
            transcendentals=Cout,  # rsqrt per output channel
        ),
    )(x, scale, conv_w_2d, gamma, beta)

    # [Cout, P] -> [1, Cout, H, W]: another free reshape (no transpose needed).
    return out.reshape(N, Cout, H, W)


def _reference(x280, x285, conv_w, bn_gamma, bn_beta):
    """Pure-JAX f32 reference matching PyTorch training-mode forward."""
    x = x285 * x280                                               # broadcast mul
    w2d = conv_w.reshape(conv_w.shape[0], conv_w.shape[1])
    y = jnp.einsum("nchw,oc->nohw", x, w2d)
    mean = jnp.mean(y, axis=(0, 2, 3), keepdims=True)
    var = jnp.mean((y - mean) ** 2, axis=(0, 2, 3), keepdims=True)
    yn = (y - mean) / jnp.sqrt(var + EPS)
    return yn * bn_gamma.reshape(1, -1, 1, 1) + bn_beta.reshape(1, -1, 1, 1)


if __name__ == "__main__":
    key = jax.random.PRNGKey(0)
    k1, k2, k3 = jax.random.split(key, 3)

    N, Cin, Cout, H, W = 1, 768, 128, 14, 14

    x280 = jax.random.normal(k1, (N, Cin, H, W), dtype=jnp.float32)
    x285 = jax.random.normal(k2, (N, Cin, 1, 1), dtype=jnp.float32)

    # Deterministic parameters (Conv2d weight ~ N(0, 0.02); BN default affine init).
    conv_w = 0.02 * jax.random.normal(k3, (Cout, Cin, 1, 1), dtype=jnp.float32)
    bn_gamma = jnp.ones((Cout,), dtype=jnp.float32)
    bn_beta = jnp.zeros((Cout,), dtype=jnp.float32)

    # One-time parameter-init cast: weight lives in HBM as bf16 [Cout, Cin].
    # (Done here, outside the per-call wrapper, so no per-call cast round trip.)
    conv_w_bf16 = conv_w.reshape(Cout, Cin).astype(jnp.bfloat16)

    out = mul_conv_bn(x280, x285, conv_w_bf16, bn_gamma, bn_beta)
    out = jax.block_until_ready(out)

    ref = _reference(x280, x285, conv_w, bn_gamma, bn_beta)
    assert out.shape == (N, Cout, H, W), out.shape
    # Only the weight is bf16-rounded (x stays f32, f32 accumulation); BN
    # re-normalization keeps the error well below 1e-2.
    max_err = float(jnp.max(jnp.abs(out - ref)))
    assert jnp.allclose(out, ref, atol=1e-2, rtol=1e-2), max_err

    print("KERNEL_OK")
</pallas_src>

<mosaic_0001>
module attributes {stable_mosaic.version = 11 : i64} {
  func.func @_fused_kernel(%arg0: memref<768x196xf32, #tpu.memory_space<vmem>>, %arg1: memref<1x768xf32, #tpu.memory_space<vmem>>, %arg2: memref<128x768xbf16, #tpu.memory_space<vmem>>, %arg3: memref<128x1xf32, #tpu.memory_space<vmem>>, %arg4: memref<128x1xf32, #tpu.memory_space<vmem>>, %arg5: memref<128x196xf32, #tpu.memory_space<vmem>>) attributes {dimension_semantics = [], scalar_prefetch = 0 : i64, scratch_operands = 0 : i64, tpu.core_type = #tpu.core_type<tc>} {
    %c0 = arith.constant 0 : index
    %c0_0 = arith.constant 0 : index
    %0 = vector.load %arg2[%c0, %c0_0] : memref<128x768xbf16, #tpu.memory_space<vmem>>, vector<128x768xbf16>
    %c0_1 = arith.constant 0 : index
    %c0_2 = arith.constant 0 : index
    %1 = vector.load %arg1[%c0_1, %c0_2] : memref<1x768xf32, #tpu.memory_space<vmem>>, vector<1x768xf32>
    %2 = arith.extf %0 : vector<128x768xbf16> to vector<128x768xf32>
    %3 = vector.broadcast %1 : vector<1x768xf32> to vector<128x768xf32>
    %4 = arith.mulf %2, %3 : vector<128x768xf32>
    %c0_3 = arith.constant 0 : index
    %c0_4 = arith.constant 0 : index
    %5 = vector.load %arg0[%c0_3, %c0_4] : memref<768x196xf32, #tpu.memory_space<vmem>>, vector<768x196xf32>
    %cst = arith.constant dense<0.000000e+00> : vector<128x196xf32>
    %6 = tpu.matmul %4, %5, %cst {dimension_numbers = #tpu.dot_dimension_numbers<[1], [0], [0], [1], [0, 0, 1, 1], [], []>} : vector<128x768xf32>, vector<768x196xf32>, vector<128x196xf32> -> vector<128x196xf32>
    %cst_5 = arith.constant dense<0.000000e+00> : vector<128xf32>
    %7 = vector.multi_reduction <add>, %6, %cst_5 [1] : vector<128x196xf32> to vector<128xf32>
    %8 = vector.shape_cast %7 : vector<128xf32> to vector<128x1xf32>
    %9 = arith.mulf %6, %6 : vector<128x196xf32>
    %cst_6 = arith.constant dense<0.000000e+00> : vector<128xf32>
    %10 = vector.multi_reduction <add>, %9, %cst_6 [1] : vector<128x196xf32> to vector<128xf32>
    %11 = vector.shape_cast %10 : vector<128xf32> to vector<128x1xf32>
    %cst_7 = arith.constant 0.00510204071 : f32
    %12 = vector.broadcast %cst_7 : f32 to vector<128x1xf32>
    %13 = arith.mulf %8, %12 : vector<128x1xf32>
    %cst_8 = arith.constant 0.00510204071 : f32
    %14 = vector.broadcast %cst_8 : f32 to vector<128x1xf32>
    %15 = arith.mulf %11, %14 : vector<128x1xf32>
    %16 = arith.mulf %13, %13 : vector<128x1xf32>
    %17 = arith.subf %15, %16 : vector<128x1xf32>
    %cst_9 = arith.constant 0.000000e+00 : f32
    %18 = vector.broadcast %cst_9 : f32 to vector<128x1xf32>
    %19 = arith.maximumf %17, %18 : vector<128x1xf32>
    %c0_10 = arith.constant 0 : index
    %c0_11 = arith.constant 0 : index
    %20 = vector.load %arg3[%c0_10, %c0_11] : memref<128x1xf32, #tpu.memory_space<vmem>>, vector<128x1xf32>
    %cst_12 = arith.constant 1.000000e-03 : f32
    %21 = vector.broadcast %cst_12 : f32 to vector<128x1xf32>
    %22 = arith.addf %19, %21 : vector<128x1xf32>
    %23 = math.rsqrt %22 : vector<128x1xf32>
    %24 = arith.mulf %20, %23 : vector<128x1xf32>
    %c0_13 = arith.constant 0 : index
    %c0_14 = arith.constant 0 : index
    %25 = vector.load %arg4[%c0_13, %c0_14] : memref<128x1xf32, #tpu.memory_space<vmem>>, vector<128x1xf32>
    %26 = arith.mulf %13, %24 : vector<128x1xf32>
    %27 = arith.subf %25, %26 : vector<128x1xf32>
    %28 = vector.broadcast %24 : vector<128x1xf32> to vector<128x196xf32>
    %29 = arith.mulf %6, %28 : vector<128x196xf32>
    %30 = vector.broadcast %27 : vector<128x1xf32> to vector<128x196xf32>
    %31 = arith.addf %29, %30 : vector<128x196xf32>
    %c0_15 = arith.constant 0 : index
    %c0_16 = arith.constant 0 : index
    %32 = vector.load %arg5[%c0_15, %c0_16] : memref<128x196xf32, #tpu.memory_space<vmem>>, vector<128x196xf32>
    tpu.vector_store %arg5[%c0_15, %c0_16], %31 {strides = array<i32>} : memref<128x196xf32, #tpu.memory_space<vmem>>, vector<128x196xf32>,
    return
  }
}

</mosaic_0001>

<bundles_post_ra>
// kernel: tpu_custom_call.1
= control target key start
LH: loop header
LB: loop body
LE: loop exit
PB: predicated region body
PF: predicated region fallthrough
CT: control target
= control target key end

     0   :  { %vm1246_vm0 = vcmask 556032   ;;  %s3954_s0 = inlined_call_operand.vmem [shape: f32[768,196], index: 0, kind: input, shape index: {}]   ;;  %s3955_s1 = inlined_call_operand.vmem [shape: f32[1,768], index: 1, kind: input, shape index: {}]   ;;  %s3956_s2 = inlined_call_operand.vmem [shape: bf16[128,768], index: 2, kind: input, shape index: {}]   ;;  %s3957_s3 = inlined_call_operand.vmem [shape: f32[128,1], index: 3, kind: input, shape index: {}]   ;;  %s3958_s4 = inlined_call_operand.vmem [shape: f32[128,1], index: 4, kind: input, shape index: {}]   ;;  %s3959_s5 = inlined_call_operand.vmem [shape: f32[128,196], index: 5, kind: output, shape index: {}]  }
   0x1   :  { %v304_v0 = vld [vmem:[%s3954_s0 + $0xf0] sm:$0xff]  ;;  %v302_v3 = vld [vmem:[%s3954_s0 + $0xe0] sm:$0xff]  ;;  %v21_v52 = vld [vmem:[%s3956_s2 + $0x8] sm:$0xff] }
   0x2   :  { %v368_v1 = vld [vmem:[%s3954_s0 + $0x2f0] sm:$0xff]  ;;  %466 = vmatpush.msra.mxu0 %v304_v0  ;;  %v366_v5 = vld [vmem:[%s3954_s0 + $0x2e0] sm:$0xff]  ;;  %v71_v61 = vunpack.c.l.bf16 %v21_v52  ;;  %v72_v63 = vunpack.c.h.bf16 %v21_v52 }
   0x3   :  { %v400_v2 = vld [vmem:[%s3954_s0 + $0x3f0] sm:$0xff]  ;;  %596 = vmatpush.msra.mxu2 %v368_v1  ;;  %v398_v6 = vld [vmem:[%s3954_s0 + $0x3e0] sm:$0xff] }
   0x4   :  { %v336_v4 = vld [vmem:[%s3954_s0 + $0x1f0] sm:$0xff]  ;;  %661 = vmatpush.msra.mxu3 %v400_v2  ;;  %v334_v8 = vld [vmem:[%s3954_s0 + $0x1e0] sm:$0xff]  ;;  %467 = vmatpush.msra.mxu0 %v302_v3 }
   0x5   :  { %531 = vmatpush.msra.mxu1 %v336_v4  ;;  %v300_v7 = vld [vmem:[%s3954_s0 + $0xd0] sm:$0xff]  ;;  %597 = vmatpush.msra.mxu2 %v366_v5  ;;  %v298_v11 = vld [vmem:[%s3954_s0 + $0xc0] sm:$0xff] }
   0x6   :  { %v364_v9 = vld [vmem:[%s3954_s0 + $0x2d0] sm:$0xff]  ;;  %662 = vmatpush.msra.mxu3 %v398_v6  ;;  %v362_v13 = vld [vmem:[%s3954_s0 + $0x2c0] sm:$0xff]  ;;  %468 = vmatpush.msra.mxu0 %v300_v7 }
   0x7   :  { %v396_v10 = vld [vmem:[%s3954_s0 + $0x3d0] sm:$0xff]  ;;  %532 = vmatpush.msra.mxu1 %v334_v8  ;;  %598 = vmatpush.msra.mxu2 %v364_v9  ;;  %v394_v14 = vld [vmem:[%s3954_s0 + $0x3c0] sm:$0xff] }
   0x8   :  { %v332_v12 = vld [vmem:[%s3954_s0 + $0x1d0] sm:$0xff]  ;;  %v330_v15 = vld [vmem:[%s3954_s0 + $0x1c0] sm:$0xff]  ;;  %663 = vmatpush.msra.mxu3 %v396_v10  ;;  %469 = vmatpush.msra.mxu0 %v298_v11 }
   0x9   :  { %533 = vmatpush.msra.mxu1 %v332_v12  ;;  %v296_v16 = vld [vmem:[%s3954_s0 + $0xb0] sm:$0xff]  ;;  %599 = vmatpush.msra.mxu2 %v362_v13  ;;  %v294_v20 = vld [vmem:[%s3954_s0 + $0xa0] sm:$0xff]  ;;  %v23_v13 = vld [vmem:[%s3956_s2 + $0x18] sm:$0xff] }
   0xa   :  { %v360_v17 = vld [vmem:[%s3954_s0 + $0x2b0] sm:$0xff]  ;;  %664 = vmatpush.msra.mxu3 %v394_v14  ;;  %v358_v21 = vld [vmem:[%s3954_s0 + $0x2a0] sm:$0xff]  ;;  %470 = vmatpush.msra.mxu0 %v296_v16 }
   0xb   :  { %v392_v18 = vld [vmem:[%s3954_s0 + $0x3b0] sm:$0xff]  ;;  %534 = vmatpush.msra.mxu1 %v330_v15  ;;  %600 = vmatpush.msra.mxu2 %v360_v17  ;;  %v390_v22 = vld [vmem:[%s3954_s0 + $0x3a0] sm:$0xff]  ;;  %v305_v15 = vld [vmem:[%s3954_s0 + $0xf8] sm:$0xff] }
   0xc   :  { %v328_v19 = vld [vmem:[%s3954_s0 + $0x1b0] sm:$0xff]  ;;  %v326_v23 = vld [vmem:[%s3954_s0 + $0x1a0] sm:$0xff]  ;;  %665 = vmatpush.msra.mxu3 %v392_v18  ;;  %471 = vmatpush.msra.mxu0 %v294_v20  ;;  %v337_v20 = vld [vmem:[%s3954_s0 + $0x1f8] sm:$0xff] }
   0xd   :  { %535 = vmatpush.msra.mxu1 %v328_v19  ;;  %v292_v24 = vld [vmem:[%s3954_s0 + $0x90] sm:$0xff]  ;;  %601 = vmatpush.msra.mxu2 %v358_v21  ;;  %v290_v28 = vld [vmem:[%s3954_s0 + $0x80] sm:$0xff]  ;;  %v75_v19 = vunpack.c.l.bf16 %v23_v13 }
   0xe   :  { %v356_v25 = vld [vmem:[%s3954_s0 + $0x290] sm:$0xff]  ;;  %666 = vmatpush.msra.mxu3 %v390_v22  ;;  %v354_v29 = vld [vmem:[%s3954_s0 + $0x280] sm:$0xff]  ;;  %472 = vmatpush.msra.mxu0 %v292_v24  ;;  %v303_v24 = vld [vmem:[%s3954_s0 + $0xe8] sm:$0xff] }
   0xf   :  { %v388_v26 = vld [vmem:[%s3954_s0 + $0x390] sm:$0xff]  ;;  %536 = vmatpush.msra.mxu1 %v326_v23  ;;  %602 = vmatpush.msra.mxu2 %v356_v25  ;;  %v386_v30 = vld [vmem:[%s3954_s0 + $0x380] sm:$0xff] }
  0x10   :  { %v324_v27 = vld [vmem:[%s3954_s0 + $0x190] sm:$0xff]  ;;  %v322_v31 = vld [vmem:[%s3954_s0 + $0x180] sm:$0xff]  ;;  %667 = vmatpush.msra.mxu3 %v388_v26  ;;  %473 = vmatpush.msra.mxu0 %v290_v28  ;;  %v76_v26 = vunpack.c.h.bf16 %v23_v13 }
  0x11   :  { %537 = vmatpush.msra.mxu1 %v324_v27  ;;  %v288_v32 = vld [vmem:[%s3954_s0 + $0x70] sm:$0xff]  ;;  %603 = vmatpush.msra.mxu2 %v354_v29  ;;  %v286_v36 = vld [vmem:[%s3954_s0 + $0x60] sm:$0xff]  ;;  %v335_v27 = vld [vmem:[%s3954_s0 + $0x1e8] sm:$0xff] }
  0x12   :  { %v352_v33 = vld [vmem:[%s3954_s0 + $0x270] sm:$0xff]  ;;  %668 = vmatpush.msra.mxu3 %v386_v30  ;;  %v350_v37 = vld [vmem:[%s3954_s0 + $0x260] sm:$0xff]  ;;  %474 = vmatpush.msra.mxu0 %v288_v32  ;;  %v301_v30 = vld [vmem:[%s3954_s0 + $0xd8] sm:$0xff] }
  0x13   :  { %v384_v34 = vld [vmem:[%s3954_s0 + $0x370] sm:$0xff]  ;;  %538 = vmatpush.msra.mxu1 %v322_v31  ;;  %604 = vmatpush.msra.mxu2 %v352_v33  ;;  %v382_v38 = vld [vmem:[%s3954_s0 + $0x360] sm:$0xff] }
  0x14   :  { %v320_v35 = vld [vmem:[%s3954_s0 + $0x170] sm:$0xff]  ;;  %v318_v39 = vld [vmem:[%s3954_s0 + $0x160] sm:$0xff]  ;;  %669 = vmatpush.msra.mxu3 %v384_v34  ;;  %475 = vmatpush.msra.mxu0 %v286_v36  ;;  %v27_v36 = vld [vmem:[%s3956_s2 + $0x38] sm:$0xff] }
  0x15   :  { %539 = vmatpush.msra.mxu1 %v320_v35  ;;  %v284_v40 = vld [vmem:[%s3954_s0 + $0x50] sm:$0xff]  ;;  %605 = vmatpush.msra.mxu2 %v350_v37  ;;  %v282_v44 = vld [vmem:[%s3954_s0 + $0x40] sm:$0xff]  ;;  %v333_v35 = vld [vmem:[%s3954_s0 + $0x1d8] sm:$0xff] }
  0x16   :  { %v348_v41 = vld [vmem:[%s3954_s0 + $0x250] sm:$0xff]  ;;  %670 = vmatpush.msra.mxu3 %v382_v38  ;;  %v346_v45 = vld [vmem:[%s3954_s0 + $0x240] sm:$0xff]  ;;  %476 = vmatpush.msra.mxu0 %v284_v40 }
  0x17   :  { %v380_v42 = vld [vmem:[%s3954_s0 + $0x350] sm:$0xff]  ;;  %540 = vmatpush.msra.mxu1 %v318_v39  ;;  %v378_v46 = vld [vmem:[%s3954_s0 + $0x340] sm:$0xff]  ;;  %606 = vmatpush.msra.mxu2 %v348_v41  ;;  %v299_v39 = vld [vmem:[%s3954_s0 + $0xc8] sm:$0xff] }
  0x18   :  { %v316_v43 = vld [vmem:[%s3954_s0 + $0x150] sm:$0xff]  ;;  %v314_v47 = vld [vmem:[%s3954_s0 + $0x140] sm:$0xff]  ;;  %671 = vmatpush.msra.mxu3 %v380_v42  ;;  %477 = vmatpush.msra.mxu0 %v282_v44  ;;  %v83_v42 = vunpack.c.l.bf16 %v27_v36  ;;  %v331_v44 = vld [vmem:[%s3954_s0 + $0x1c8] sm:$0xff] }
  0x19   :  { %v20_v48 = vld [vmem:[%s3956_s2] sm:$0xff]  ;;  %541 = vmatpush.msra.mxu1 %v316_v43  ;;  %v280_v50 = vld [vmem:[%s3954_s0 + $0x30] sm:$0xff]  ;;  %607 = vmatpush.msra.mxu2 %v346_v45  ;;  %v84_v43 = vunpack.c.h.bf16 %v27_v36 }
  0x1a   :  { %v2220_v49 = vld [vmem:[%s3955_s1] sm:$0x3f]  ;;  %v344_v51 = vld [vmem:[%s3954_s0 + $0x230] sm:$0xff]  ;;  %672 = vmatpush.msra.mxu3 %v378_v46  ;;  %v69_v57 = vunpack.c.l.bf16 %v20_v48  ;;  %478 = vmatpush.msra.mxu0 %v280_v50  ;;  %v70_v5 = vunpack.c.h.bf16 %v20_v48  ;;  %v297_v46 = vld [vmem:[%s3954_s0 + $0xb8] sm:$0xff] }
  0x1b   :  { %v376_v53 = vld [vmem:[%s3954_s0 + $0x330] sm:$0xff]  ;;  %542 = vmatpush.msra.mxu1 %v314_v47  ;;  %v278_v55 = vld [vmem:[%s3954_s0 + $0x20] sm:$0xff]  ;;  %v2244_v58 = vperm.slane %v2220_v49, 0  ;;  %608 = vmatpush.msra.mxu2 %v344_v51  ;;  %v2253_v62 = vperm.slane %v2220_v49, 2  ;;  %v2256_v0 = vperm.slane %v2220_v49, 3  ;;  %v2271_v6 = vperm.slane %v2220_v49, 1 }
  0x1c   :  { %v312_v54 = vld [vmem:[%s3954_s0 + $0x130] sm:$0xff]  ;;  %v342_v56 = vld [vmem:[%s3954_s0 + $0x220] sm:$0xff]  ;;  %673 = vmatpush.msra.mxu3 %v376_v53  ;;  %479 = vmatpush.msra.mxu0 %v278_v55  ;;  %v329_v50 = vld [vmem:[%s3954_s0 + $0x1b8] sm:$0xff] }
  0x1d   :  { %v374_v59 = vld [vmem:[%s3954_s0 + $0x320] sm:$0xff]  ;;  %543 = vmatpush.msra.mxu1 %v312_v54  ;;  %v276_v1 = vld [vmem:[%s3954_s0 + $0x10] sm:$0xff]  ;;  %609 = vmatpush.msra.mxu2 %v342_v56  ;;  %v2280_v9 = vmul.f32 %v2244_v58, %v69_v57  ;;  %v2286_v11 = vmul.f32 %v2253_v62, %v71_v61  ;;  %v2289_v12 = vmul.f32 %v2256_v0, %v72_v63  ;;  %v295_v53 = vld [vmem:[%s3954_s0 + $0xa8] sm:$0xff] }
  0x1e   :  { %v310_v60 = vld [vmem:[%s3954_s0 + $0x120] sm:$0xff]  ;;  %v340_v2 = vld [vmem:[%s3954_s0 + $0x210] sm:$0xff]  ;;  %674 = vmatpush.msra.mxu3 %v374_v59  ;;  %480 = vmatpush.msra.mxu0 %v276_v1  ;;  %v2304_v17 = vmul.f32 %v2271_v6, %v70_v5  ;;  %v2332_v29 = vmul.f32 %v2244_v58, %v75_v19  ;;  %v2356_v37 = vmul.f32 %v2271_v6, %v76_v26  ;;  %v29_v57 = vld [vmem:[%s3956_s2 + $0x48] sm:$0xff] }
  0x1f   :  { %v372_v3 = vld [vmem:[%s3954_s0 + $0x310] sm:$0xff]  ;;  %544 = vmatpush.msra.mxu1 %v310_v60  ;;  %v274_v7 = vld [vmem:[%s3954_s0] sm:$0xff]  ;;  %610 = vmatpush.msra.mxu2 %v340_v2  ;;  %v2399_v55 = vmul.f32 %v2253_v62, %v83_v42  ;;  %v2402_v56 = vmul.f32 %v2256_v0, %v84_v43  ;;  %v327_v59 = vld [vmem:[%s3954_s0 + $0x1a8] sm:$0xff]  ;;  %v87_v1 = vunpack.c.l.bf16 %v29_v57  ;;  %v88_v5 = vunpack.c.h.bf16 %v29_v57 }
  0x20   :  { %v308_v4 = vld [vmem:[%s3954_s0 + $0x110] sm:$0xff]  ;;  %v338_v8 = vld [vmem:[%s3954_s0 + $0x200] sm:$0xff]  ;;  %675 = vmatpush.msra.mxu3 %v372_v3  ;;  %481 = vmatpush.msra.mxu0 %v274_v7  ;;  %v323_v26 = vld [vmem:[%s3954_s0 + $0x188] sm:$0xff] }
  0x21   :  { %v370_v10 = vld [vmem:[%s3954_s0 + $0x300] sm:$0xff]  ;;  %545 = vmatpush.msra.mxu1 %v308_v4  ;;  %611 = vmatpush.msra.mxu2 %v338_v8  ;;  %v432_v18 = vld [vmem:[%s3954_s0 + $0x4f0] sm:$0xff]  ;;  %v293_v4 = vld [vmem:[%s3954_s0 + $0x98] sm:$0xff]  ;;  %v2436_v13 = vmul.f32 %v2244_v58, %v87_v1  ;;  %v2451_v19 = vmul.f32 %v2271_v6, %v88_v5 }
  0x22   :  { %v24_v14 = vld [vmem:[%s3956_s2 + $0x20] sm:$0xff]  ;;  %676 = vmatpush.msra.mxu3 %v370_v10  ;;  %482 = vmatmul.f32.vlgmr.msra.gmra.mxu0 %v2280_v9  ;;  %v464_v21 = vld [vmem:[%s3954_s0 + $0x5f0] sm:$0xff]  ;;  %v325_v8 = vld [vmem:[%s3954_s0 + $0x198] sm:$0xff] }
  0x23   :  { %v306_v16 = vld [vmem:[%s3954_s0 + $0x100] sm:$0xff]  ;;  %612 = vmatmul.f32.vlgmr.msra.gmra.mxu2 %v2286_v11  ;;  %677 = vmatmul.f32.vlgmr.msra.gmra.mxu3 %v2289_v12  ;;  %v77_v22 = vunpack.c.l.bf16 %v24_v14  ;;  %v78_v23 = vunpack.c.h.bf16 %v24_v14  ;;  %v428_v31 = vld [vmem:[%s3954_s0 + $0x4d0] sm:$0xff] }
  0x24   :  { %856 = vmatpush.msrb.mxu2 %v305_v15  ;;  %546 = vmatpush.msra.mxu1 %v306_v16  ;;  %v430_v25 = vld [vmem:[%s3954_s0 + $0x4e0] sm:$0xff]  ;;  %v26_v34 = vld [vmem:[%s3956_s2 + $0x30] sm:$0xff] }
  0x25   :  { %547 = vmatmul.f32.vlgmr.msra.gmra.mxu1 %v2304_v17  ;;  %726 = vmatpush.msrb.mxu0 %v432_v18  ;;  %v462_v28 = vld [vmem:[%s3954_s0 + $0x5e0] sm:$0xff]  ;;  %v2341_v32 = vmul.f32 %v2253_v62, %v77_v22  ;;  %v2344_v33 = vmul.f32 %v2256_v0, %v78_v23  ;;  %v460_v38 = vld [vmem:[%s3954_s0 + $0x5d0] sm:$0xff]  ;;  %v81_v40 = vunpack.c.l.bf16 %v26_v34  ;;  %v82_v48 = vunpack.c.h.bf16 %v26_v34  ;;  %v33_v18 = vld [vmem:[%s3956_s2 + $0x68] sm:$0xff] }
  0x26   :  { %921 = vmatpush.msrb.mxu3 %v337_v20  ;;  %791 = vmatpush.msrb.mxu1 %v464_v21  ;;  %v426_v41 = vld [vmem:[%s3954_s0 + $0x4c0] sm:$0xff]  ;;  %v424_v47 = vld [vmem:[%s3954_s0 + $0x4b0] sm:$0xff]  ;;  %v95_v21 = vunpack.c.l.bf16 %v33_v18  ;;  %v96_v22 = vunpack.c.h.bf16 %v33_v18  ;;  %v291_v23 = vld [vmem:[%s3954_s0 + $0x88] sm:$0xff] }
  0x27   :  { %857 = vmatpush.msrb.mxu2 %v303_v24  ;;  %727 = vmatpush.msrb.mxu0 %v430_v25  ;;  %v458_v45 = vld [vmem:[%s3954_s0 + $0x5c0] sm:$0xff]  ;;  %v456_v51 = vld [vmem:[%s3954_s0 + $0x5b0] sm:$0xff]  ;;  %v2390_v52 = vmul.f32 %v2244_v58, %v81_v40  ;;  %v2414_v61 = vmul.f32 %v2271_v6, %v82_v48  ;;  %v35_v34 = vld [vmem:[%s3956_s2 + $0x78] sm:$0xff] }
  0x28   :  { %922 = vmatpush.msrb.mxu3 %v335_v27  ;;  %792 = vmatpush.msrb.mxu1 %v462_v28  ;;  %v422_v54 = vld [vmem:[%s3954_s0 + $0x4a0] sm:$0xff]  ;;  %v30_v60 = vld [vmem:[%s3956_s2 + $0x50] sm:$0xff]  ;;  %v100_v42 = vunpack.c.h.bf16 %v35_v34 }
  0x29   :  { %858 = vmatpush.msrb.mxu2 %v301_v30  ;;  %728 = vmatpush.msrb.mxu0 %v428_v31  ;;  %v454_v63 = vld [vmem:[%s3954_s0 + $0x5a0] sm:$0xff]  ;;  %v89_v2 = vunpack.c.l.bf16 %v30_v60  ;;  %v90_v3 = vunpack.c.h.bf16 %v30_v60  ;;  %v420_v7 = vld [vmem:[%s3954_s0 + $0x490] sm:$0xff]  ;;  %v2473_v30 = vmul.f32 %v2253_v62, %v95_v21  ;;  %v2476_v31 = vmul.f32 %v2256_v0, %v96_v22  ;;  %v287_v60 = vld [vmem:[%s3954_s0 + $0x68] sm:$0xff] }
  0x2a   :  { %485 = vmatmul.f32.gmra.mxu0 %v2332_v29  ;;  %923 = vmatpush.msrb.mxu3 %v333_v35  ;;  %v452_v10 = vld [vmem:[%s3954_s0 + $0x590] sm:$0xff]  ;;  %v32_v16 = vld [vmem:[%s3956_s2 + $0x60] sm:$0xff]  ;;  %v285_v22 = vld [vmem:[%s3954_s0 + $0x58] sm:$0xff] }
  0x2b   :  { %615 = vmatmul.f32.gmra.mxu2 %v2341_v32  ;;  %680 = vmatmul.f32.gmra.mxu3 %v2344_v33  ;;  %v2439_v14 = vmul.f32 %v2253_v62, %v89_v2  ;;  %v2442_v15 = vmul.f32 %v2256_v0, %v90_v3  ;;  %v93_v20 = vunpack.c.l.bf16 %v32_v16  ;;  %v94_v24 = vunpack.c.h.bf16 %v32_v16  ;;  %v418_v25 = vld [vmem:[%s3954_s0 + $0x480] sm:$0xff]  ;;  %v416_v43 = vld [vmem:[%s3954_s0 + $0x470] sm:$0xff]  ;;  %v319_v2 = vld [vmem:[%s3954_s0 + $0x168] sm:$0xff] }
  0x2c   :  { %793 = vmatpush.msrb.mxu1 %v460_v38  ;;  %859 = vmatpush.msrb.mxu2 %v299_v39  ;;  %v450_v27 = vld [vmem:[%s3954_s0 + $0x580] sm:$0xff]  ;;  %v99_v38 = vunpack.c.l.bf16 %v35_v34 }
  0x2d   :  { %550 = vmatmul.f32.gmra.mxu1 %v2356_v37  ;;  %729 = vmatpush.msrb.mxu0 %v426_v41  ;;  %v2470_v28 = vmul.f32 %v2244_v58, %v93_v20  ;;  %v36_v35 = vld [vmem:[%s3956_s2 + $0x80] sm:$0xff]  ;;  %v2485_v36 = vmul.f32 %v2271_v6, %v94_v24  ;;  %v289_v41 = vld [vmem:[%s3954_s0 + $0x78] sm:$0xff]  ;;  %v412_v24 = vld [vmem:[%s3954_s0 + $0x450] sm:$0xff] }
  0x2e   :  { %924 = vmatpush.msrb.mxu3 %v331_v44  ;;  %794 = vmatpush.msrb.mxu1 %v458_v45  ;;  %v101_v39 = vunpack.c.l.bf16 %v36_v35  ;;  %v102_v40 = vunpack.c.h.bf16 %v36_v35  ;;  %v321_v44 = vld [vmem:[%s3954_s0 + $0x178] sm:$0xff]  ;;  %v448_v45 = vld [vmem:[%s3954_s0 + $0x570] sm:$0xff]  ;;  %v414_v1 = vld [vmem:[%s3954_s0 + $0x460] sm:$0xff] }
  0x2f   :  { %860 = vmatpush.msrb.mxu2 %v297_v46  ;;  %730 = vmatpush.msrb.mxu0 %v424_v47  ;;  %v2504_v46 = vmul.f32 %v2244_v58, %v99_v38  ;;  %v446_v3 = vld [vmem:[%s3954_s0 + $0x560] sm:$0xff] }
  0x30   :  { %925 = vmatpush.msrb.mxu3 %v329_v50  ;;  %795 = vmatpush.msrb.mxu1 %v456_v51  ;;  %v2507_v47 = vmul.f32 %v2253_v62, %v101_v39  ;;  %v2510_v48 = vmul.f32 %v2256_v0, %v102_v40  ;;  %v38_v50 = vld [vmem:[%s3956_s2 + $0x90] sm:$0xff]  ;;  %v39_v51 = vld [vmem:[%s3956_s2 + $0x98] sm:$0xff]  ;;  %v44_v38 = vld [vmem:[%s3956_s2 + $0xc0] sm:$0xff] }
  0x31   :  { %861 = vmatpush.msrb.mxu2 %v295_v53  ;;  %731 = vmatpush.msrb.mxu0 %v422_v54  ;;  %v2519_v53 = vmul.f32 %v2271_v6, %v100_v42  ;;  %v105_v54 = vunpack.c.l.bf16 %v38_v50  ;;  %v107_v57 = vunpack.c.l.bf16 %v39_v51  ;;  %v45_v39 = vld [vmem:[%s3956_s2 + $0xc8] sm:$0xff] }
  0x32   :  { %488 = vmatmul.f32.gmra.mxu0 %v2390_v52  ;;  %926 = vmatpush.msrb.mxu3 %v327_v59  ;;  %v108_v59 = vunpack.c.h.bf16 %v39_v51  ;;  %v119_v42 = vunpack.c.l.bf16 %v45_v39  ;;  %v315_v51 = vld [vmem:[%s3954_s0 + $0x148] sm:$0xff] }
  0x33   :  { %618 = vmatmul.f32.gmra.mxu2 %v2399_v55  ;;  %683 = vmatmul.f32.gmra.mxu3 %v2402_v56  ;;  %v2541_v5 = vmul.f32 %v2253_v62, %v107_v57 }
  0x34   :  { %796 = vmatpush.msrb.mxu1 %v454_v63  ;;  %862 = vmatpush.msrb.mxu2 %v293_v4  ;;  %v106_v63 = vunpack.c.h.bf16 %v38_v50  ;;  %v2538_v4 = vmul.f32 %v2244_v58, %v105_v54  ;;  %v410_v50 = vld [vmem:[%s3954_s0 + $0x440] sm:$0xff] }
  0x35   :  { %553 = vmatmul.f32.gmra.mxu1 %v2414_v61  ;;  %732 = vmatpush.msrb.mxu0 %v420_v7  ;;  %v2544_v7 = vmul.f32 %v2256_v0, %v108_v59  ;;  %v442_v54 = vld [vmem:[%s3954_s0 + $0x540] sm:$0xff]  ;;  %v2609_v59 = vmul.f32 %v2253_v62, %v119_v42 }
  0x36   :  { %927 = vmatpush.msrb.mxu3 %v325_v8  ;;  %797 = vmatpush.msrb.mxu1 %v452_v10  ;;  %v41_v8 = vld [vmem:[%s3956_s2 + $0xa8] sm:$0xff]  ;;  %v42_v10 = vld [vmem:[%s3956_s2 + $0xb0] sm:$0xff]  ;;  %v2553_v16 = vmul.f32 %v2271_v6, %v106_v63  ;;  %v47_v63 = vld [vmem:[%s3956_s2 + $0xd8] sm:$0xff] }
  0x37   :  { %863 = vmatpush.msrb.mxu2 %v291_v23  ;;  %733 = vmatpush.msrb.mxu0 %v418_v25  ;;  %v111_v18 = vunpack.c.l.bf16 %v41_v8  ;;  %v113_v20 = vunpack.c.l.bf16 %v42_v10  ;;  %v114_v21 = vunpack.c.h.bf16 %v42_v10  ;;  %v112_v23 = vunpack.c.h.bf16 %v41_v8  ;;  %v317_v25 = vld [vmem:[%s3954_s0 + $0x158] sm:$0xff]  ;;  %3985 = vst [vmem:[#allocation3_spill] sm:$0xff] %v2609_v59 }
  0x38   :  { %928 = vmatpush.msrb.mxu3 %v323_v26  ;;  %798 = vmatpush.msrb.mxu1 %v450_v27  ;;  %v444_v26 = vld [vmem:[%s3954_s0 + $0x550] sm:$0xff] }
  0x39   :  { %864 = vmatpush.msrb.mxu2 %v289_v41  ;;  %734 = vmatpush.msrb.mxu0 %v416_v43  ;;  %v2572_v27 = vmul.f32 %v2244_v58, %v111_v18  ;;  %v2575_v34 = vmul.f32 %v2253_v62, %v113_v20  ;;  %v2578_v35 = vmul.f32 %v2256_v0, %v114_v21  ;;  %v117_v41 = vunpack.c.l.bf16 %v44_v38  ;;  %v281_v18 = vld [vmem:[%s3954_s0 + $0x38] sm:$0xff]  ;;  %v408_v21 = vld [vmem:[%s3954_s0 + $0x430] sm:$0xff] }
  0x3a   :  { %491 = vmatmul.f32.gmra.mxu0 %v2436_v13  ;;  %929 = vmatpush.msrb.mxu3 %v321_v44  ;;  %v2587_v40 = vmul.f32 %v2271_v6, %v112_v23  ;;  %v120_v43 = vunpack.c.h.bf16 %v45_v39  ;;  %v283_v44 = vld [vmem:[%s3954_s0 + $0x48] sm:$0xff]  ;;  %v124_v20 = vunpack.c.h.bf16 %v47_v63  ;;  %v440_v23 = vld [vmem:[%s3954_s0 + $0x530] sm:$0xff]  ;;  %v51_v39 = vld [vmem:[%s3956_s2 + $0xf8] sm:$0xff] }
  0x3b   :  { %621 = vmatmul.f32.gmra.mxu2 %v2439_v14  ;;  %686 = vmatmul.f32.gmra.mxu3 %v2442_v15  ;;  %3984 = vst [vmem:[#allocation2_spill] sm:$0xff] %v2578_v35  ;;  %v2606_v57 = vmul.f32 %v2244_v58, %v117_v41 }
  0x3c   :  { %799 = vmatpush.msrb.mxu1 %v448_v45  ;;  %865 = vmatpush.msrb.mxu2 %v287_v60  ;;  %v118_v45 = vunpack.c.h.bf16 %v44_v38  ;;  %v2612_v60 = vmul.f32 %v2256_v0, %v120_v43  ;;  %v50_v38 = vld [vmem:[%s3956_s2 + $0xf0] sm:$0xff]  ;;  %v2655_v41 = vmul.f32 %v2271_v6, %v124_v20  ;;  %v131_v43 = vunpack.c.l.bf16 %v51_v39 }
  0x3d   :  { %556 = vmatmul.f32.gmra.mxu1 %v2451_v19  ;;  %735 = vmatpush.msrb.mxu0 %v414_v1  ;;  %v48_v1 = vld [vmem:[%s3956_s2 + $0xe0] sm:$0xff]  ;;  %v129_v42 = vunpack.c.l.bf16 %v50_v38 }
  0x3e   :  { %930 = vmatpush.msrb.mxu3 %v319_v2  ;;  %800 = vmatpush.msrb.mxu1 %v446_v3  ;;  %3986 = vst [vmem:[#allocation4_spill] sm:$0xff] %v2612_v60  ;;  %v2621_v2 = vmul.f32 %v2271_v6, %v118_v45  ;;  %v123_v3 = vunpack.c.l.bf16 %v47_v63  ;;  %v125_v8 = vunpack.c.l.bf16 %v48_v1  ;;  %v126_v10 = vunpack.c.h.bf16 %v48_v1  ;;  %v279_v45 = vld [vmem:[%s3954_s0 + $0x28] sm:$0xff]  ;;  %v438_v63 = vld [vmem:[%s3954_s0 + $0x520] sm:$0xff] }
  0x3f   :  { %866 = vmatpush.msrb.mxu2 %v285_v22  ;;  %736 = vmatpush.msrb.mxu0 %v412_v24  ;;  %v313_v22 = vld [vmem:[%s3954_s0 + $0x138] sm:$0xff]  ;;  %v2674_v1 = vmul.f32 %v2244_v58, %v129_v42  ;;  %v404_v42 = vld [vmem:[%s3954_s0 + $0x410] sm:$0xff] }
  0x40   :  { %931 = vmatpush.msrb.mxu3 %v317_v25  ;;  %801 = vmatpush.msrb.mxu1 %v444_v26  ;;  %v2640_v24 = vmul.f32 %v2244_v58, %v123_v3  ;;  %v2643_v25 = vmul.f32 %v2253_v62, %v125_v8  ;;  %v2646_v26 = vmul.f32 %v2256_v0, %v126_v10  ;;  %v53_v10 = vld [vmem:[%s3956_s2 + $0x108] sm:$0xff] }
  0x41   :  { %867 = vmatpush.msrb.mxu2 %v283_v44  ;;  %737 = vmatpush.msrb.mxu0 %v410_v50  ;;  %v132_v44 = vunpack.c.h.bf16 %v51_v39  ;;  %v130_v50 = vunpack.c.h.bf16 %v50_v38  ;;  %v2677_v3 = vmul.f32 %v2253_v62, %v131_v43  ;;  %v277_v38 = vld [vmem:[%s3954_s0 + $0x18] sm:$0xff]  ;;  %v136_v39 = vunpack.c.h.bf16 %v53_v10 }
  0x42   :  { %494 = vmatmul.f32.gmra.mxu0 %v2470_v28  ;;  %932 = vmatpush.msrb.mxu3 %v315_v51  ;;  %3987 = vst [vmem:[#allocation5_spill] sm:$0xff] %v2643_v25  ;;  %v406_v51 = vld [vmem:[%s3954_s0 + $0x420] sm:$0xff]  ;;  %v309_v43 = vld [vmem:[%s3954_s0 + $0x118] sm:$0xff] }
  0x43   :  { %624 = vmatmul.f32.gmra.mxu2 %v2473_v30  ;;  %689 = vmatmul.f32.gmra.mxu3 %v2476_v31  ;;  %3988 = vst [vmem:[#allocation6_spill] sm:$0xff] %v2646_v26  ;;  %v2680_v8 = vmul.f32 %v2256_v0, %v132_v44  ;;  %v2689_v20 = vmul.f32 %v2271_v6, %v130_v50  ;;  %v436_v44 = vld [vmem:[%s3954_s0 + $0x510] sm:$0xff] }
  0x44   :  { %802 = vmatpush.msrb.mxu1 %v442_v54  ;;  %868 = vmatpush.msrb.mxu2 %v281_v18  ;;  %v311_v54 = vld [vmem:[%s3954_s0 + $0x128] sm:$0xff]  ;;  %3989 = vst [vmem:[#allocation7_spill] sm:$0xff] %v2677_v3  ;;  %v54_v18 = vld [vmem:[%s3956_s2 + $0x110] sm:$0xff] }
  0x45   :  { %559 = vmatmul.f32.gmra.mxu1 %v2485_v36  ;;  %738 = vmatpush.msrb.mxu0 %v408_v21  ;;  %3990 = vst [vmem:[#allocation8_spill] sm:$0xff] %v2680_v8  ;;  %v135_v21 = vunpack.c.l.bf16 %v53_v10  ;;  %v2723_v10 = vmul.f32 %v2271_v6, %v136_v39  ;;  %v402_v39 = vld [vmem:[%s3954_s0 + $0x400] sm:$0xff] }
  0x46   :  { %933 = vmatpush.msrb.mxu3 %v313_v22  ;;  %803 = vmatpush.msrb.mxu1 %v440_v23  ;;  %v137_v22 = vunpack.c.l.bf16 %v54_v18  ;;  %v138_v23 = vunpack.c.h.bf16 %v54_v18 }
  0x47   :  { %869 = vmatpush.msrb.mxu2 %v279_v45  ;;  %739 = vmatpush.msrb.mxu0 %v406_v51  ;;  %v2708_v45 = vmul.f32 %v2244_v58, %v135_v21 }
  0x48   :  { %934 = vmatpush.msrb.mxu3 %v311_v54  ;;  %804 = vmatpush.msrb.mxu1 %v438_v63  ;;  %v2711_v50 = vmul.f32 %v2253_v62, %v137_v22  ;;  %v2714_v51 = vmul.f32 %v2256_v0, %v138_v23  ;;  %v56_v54 = vld [vmem:[%s3956_s2 + $0x120] sm:$0xff]  ;;  %v57_v63 = vld [vmem:[%s3956_s2 + $0x128] sm:$0xff] }
  0x49   :  { %870 = vmatpush.msrb.mxu2 %v277_v38  ;;  %740 = vmatpush.msrb.mxu0 %v404_v42  ;;  %v141_v18 = vunpack.c.l.bf16 %v56_v54  ;;  %v143_v21 = vunpack.c.l.bf16 %v57_v63  ;;  %v144_v22 = vunpack.c.h.bf16 %v57_v63  ;;  %v275_v23 = vld [vmem:[%s3954_s0 + $0x8] sm:$0xff]  ;;  %v142_v38 = vunpack.c.h.bf16 %v56_v54 }
  0x4a   :  { %497 = vmatmul.f32.gmra.mxu0 %v2504_v46  ;;  %935 = vmatpush.msrb.mxu3 %v309_v43  ;;  %3991 = vst [vmem:[#allocation9_spill] sm:$0xff] %v2711_v50  ;;  %v307_v42 = vld [vmem:[%s3954_s0 + $0x108] sm:$0xff]  ;;  %v434_v43 = vld [vmem:[%s3954_s0 + $0x500] sm:$0xff] }
  0x4b   :  { %627 = vmatmul.f32.gmra.mxu2 %v2507_v47  ;;  %692 = vmatmul.f32.gmra.mxu3 %v2510_v48  ;;  %3992 = vst [vmem:[#allocation10_spill] sm:$0xff] %v2714_v51  ;;  %v2745_v63 = vmul.f32 %v2253_v62, %v143_v21  ;;  %v2748_v54 = vmul.f32 %v2256_v0, %v144_v22 }
  0x4c   :  { %805 = vmatpush.msrb.mxu1 %v436_v44  ;;  %871 = vmatpush.msrb.mxu2 %v275_v23  ;;  %v2742_v44 = vmul.f32 %v2244_v58, %v141_v18  ;;  %v59_v23 = vld [vmem:[%s3956_s2 + $0x138] sm:$0xff]  ;;  %v2757_v18 = vmul.f32 %v2271_v6, %v142_v38 }
  0x4d   :  { %562 = vmatmul.f32.gmra.mxu1 %v2519_v53  ;;  %741 = vmatpush.msrb.mxu0 %v402_v39  ;;  %3993 = vst [vmem:[#allocation11_spill] sm:$0xff] %v2745_v63  ;;  %v147_v39 = vunpack.c.l.bf16 %v59_v23  ;;  %v369_v38 = vld [vmem:[%s3954_s0 + $0x2f8] sm:$0xff] }
  0x4e   :  { %936 = vmatpush.msrb.mxu3 %v307_v42  ;;  %3994 = vst [vmem:[#allocation12_spill] sm:$0xff] %v2748_v54  ;;  %806 = vmatpush.msrb.mxu1 %v434_v43  ;;  %v433_v42 = vld [vmem:[%s3954_s0 + $0x4f8] sm:$0xff]  ;;  %v148_v43 = vunpack.c.h.bf16 %v59_v23  ;;  %v62_v23 = vld [vmem:[%s3956_s2 + $0x150] sm:$0xff] }
  0x4f   :  { %1116 = vmatpush.msra.mxu2 %v433_v42  ;;  %986 = vmatpush.msra.mxu0 %v369_v38  ;;  %v431_v38 = vld [vmem:[%s3954_s0 + $0x4e8] sm:$0xff] }
  0x51   :  { %1117 = vmatpush.msra.mxu2 %v431_v38 }
  0x52   :  { %500 = vmatmul.f32.gmra.mxu0 %v2538_v4 }
  0x53   :  { %630 = vmatmul.f32.gmra.mxu2 %v2541_v5  ;;  %695 = vmatmul.f32.gmra.mxu3 %v2544_v7 }
  0x55   :  { %565 = vmatmul.f32.gmra.mxu1 %v2553_v16 }
  0x5a   :  { %503 = vmatmul.f32.gmra.mxu0 %v2572_v27 }
  0x5b   :  { %633 = vmatmul.f32.gmra.mxu2 %v2575_v34  ;;  %698 = vmatmul.f32.gmra.mxu3 %v2578_v35 }
  0x5d   :  { %568 = vmatmul.f32.gmra.mxu1 %v2587_v40 }
  0x62   :  { %506 = vmatmul.f32.gmra.mxu0 %v2606_v57 }
  0x63   :  { %636 = vmatmul.f32.gmra.mxu2 %v2609_v59  ;;  %701 = vmatmul.f32.gmra.mxu3 %v2612_v60  ;;  %v393_v59 = vld [vmem:[%s3954_s0 + $0x3b8] sm:$0xff] }
  0x65   :  { %571 = vmatmul.f32.gmra.mxu1 %v2621_v2 }
  0x6a   :  { %509 = vmatmul.f32.gmra.mxu0 %v2640_v24 }
  0x6b   :  { %639 = vmatmul.f32.gmra.mxu2 %v2643_v25  ;;  %704 = vmatmul.f32.gmra.mxu3 %v2646_v26  ;;  %v365_v25 = vld [vmem:[%s3954_s0 + $0x2d8] sm:$0xff] }
  0x6d   :  { %574 = vmatmul.f32.gmra.mxu1 %v2655_v41 }
  0x72   :  { %512 = vmatmul.f32.gmra.mxu0 %v2674_v1 }
  0x73   :  { %642 = vmatmul.f32.gmra.mxu2 %v2677_v3  ;;  %707 = vmatmul.f32.gmra.mxu3 %v2680_v8  ;;  %v2788_v8 = vmul.f32 %v2271_v6, %v148_v43  ;;  %v154_v43 = vunpack.c.h.bf16 %v62_v23  ;;  %v367_v3 = vld [vmem:[%s3954_s0 + $0x2e8] sm:$0xff] }
  0x74   :  { %987 = vmatpush.msra.mxu0 %v367_v3  ;;  %v399_v3 = vld [vmem:[%s3954_s0 + $0x3e8] sm:$0xff] }
  0x75   :  { %577 = vmatmul.f32.gmra.mxu1 %v2689_v20  ;;  %v2822_v26 = vmul.f32 %v2271_v6, %v154_v43 }
  0x76   :  { %988 = vmatpush.msra.mxu0 %v365_v25 }
  0x7a   :  { %515 = vmatmul.f32.gmra.mxu0 %v2708_v45 }
  0x7b   :  { %645 = vmatmul.f32.gmra.mxu2 %v2711_v50  ;;  %710 = vmatmul.f32.gmra.mxu3 %v2714_v51  ;;  %v60_v51 = vld [vmem:[%s3956_s2 + $0x140] sm:$0xff]  ;;  %v63_v50 = vld [vmem:[%s3956_s2 + $0x158] sm:$0xff] }
  0x7c   :  { %v149_v21 = vunpack.c.l.bf16 %v60_v51  ;;  %v150_v22 = vunpack.c.h.bf16 %v60_v51 }
  0x7d   :  { %580 = vmatmul.f32.gmra.mxu1 %v2723_v10 }
  0x7e   :  { %v2776_v51 = vmul.f32 %v2253_v62, %v149_v21  ;;  %v2779_v42 = vmul.f32 %v2256_v0, %v150_v22  ;;  %v155_v21 = vunpack.c.l.bf16 %v63_v50  ;;  %v156_v22 = vunpack.c.h.bf16 %v63_v50 }
  0x80   :  { %3995 = vst [vmem:[#allocation13_spill] sm:$0xff] %v2776_v51  ;;  %v2810_v50 = vmul.f32 %v2253_v62, %v155_v21  ;;  %v2813_v38 = vmul.f32 %v2256_v0, %v156_v22 }
  0x81   :  { %3996 = vst [vmem:[#allocation14_spill] sm:$0xff] %v2779_v42 }
  0x82   :  { %518 = vmatmul.f32.gmra.mxu0 %v2742_v44  ;;  %3997 = vst [vmem:[#allocation15_spill] sm:$0xff] %v2810_v50 }
  0x83   :  { %648 = vmatmul.f32.gmra.mxu2 %v2745_v63  ;;  %713 = vmatmul.f32.gmra.mxu3 %v2748_v54  ;;  %v465_v63 = vld [vmem:[%s3954_s0 + $0x5f8] sm:$0xff]  ;;  %v2773_v54 = vmul.f32 %v2244_v58, %v147_v39  ;;  %v153_v39 = vunpack.c.l.bf16 %v62_v23  ;;  %3998 = vst [vmem:[#allocation16_spill] sm:$0xff] %v2813_v38  ;;  %v65_v23 = vld [vmem:[%s3956_s2 + $0x168] sm:$0xff] }
  0x84   :  { %1181 = vmatpush.msra.mxu3 %v465_v63  ;;  %v401_v63 = vld [vmem:[%s3954_s0 + $0x3f8] sm:$0xff]  ;;  %v160_v43 = vunpack.c.h.bf16 %v65_v23 }
  0x85   :  { %583 = vmatmul.f32.gmra.mxu1 %v2757_v18 }
  0x86   :  { %1051 = vmatpush.msra.mxu1 %v401_v63  ;;  %v463_v63 = vld [vmem:[%s3954_s0 + $0x5e8] sm:$0xff] }
  0x87   :  { %1182 = vmatpush.msra.mxu3 %v463_v63  ;;  %v429_v63 = vld [vmem:[%s3954_s0 + $0x4d8] sm:$0xff] }
  0x88   :  { %1052 = vmatpush.msra.mxu1 %v399_v3  ;;  %1118 = vmatpush.msra.mxu2 %v429_v63  ;;  %v461_v3 = vld [vmem:[%s3954_s0 + $0x5d8] sm:$0xff] }
  0x89   :  { %1183 = vmatpush.msra.mxu3 %v461_v3 }
  0x8a   :  { %521 = vmatmul.f32.gmra.mxu0 %v2773_v54 }
  0x8b   :  { %651 = vmatmul.f32.gmra.mxu2 %v2776_v51  ;;  %716 = vmatmul.f32.gmra.mxu3 %v2779_v42  ;;  %v2807_v42 = vmul.f32 %v2244_v58, %v153_v39  ;;  %v66_v51 = vld [vmem:[%s3956_s2 + $0x170] sm:$0xff]  ;;  %v159_v39 = vunpack.c.l.bf16 %v65_v23 }
  0x8c   :  { %v161_v21 = vunpack.c.l.bf16 %v66_v51  ;;  %v162_v22 = vunpack.c.h.bf16 %v66_v51  ;;  %v22_v23 = vld [vmem:[%s3956_s2 + $0x10] sm:$0xff] }
  0x8d   :  { %586 = vmatmul.f32.gmra.mxu1 %v2788_v8  ;;  %v73_v25 = vunpack.c.l.bf16 %v22_v23 }
  0x8e   :  { %v2844_v51 = vmul.f32 %v2253_v62, %v161_v21  ;;  %v2847_v63 = vmul.f32 %v2256_v0, %v162_v22  ;;  %v2860_v62 = vperm.slane %v2220_v49, 4  ;;  %v427_v0 = vld [vmem:[%s3954_s0 + $0x4c8] sm:$0xff] }
  0x8f   :  { %1119 = vmatpush.msra.mxu2 %v427_v0  ;;  %v363_v21 = vld [vmem:[%s3954_s0 + $0x2c8] sm:$0xff] }
  0x90   :  { %3999 = vst [vmem:[#allocation17_spill] sm:$0xff] %v2844_v51  ;;  %v459_v22 = vld [vmem:[%s3954_s0 + $0x5c8] sm:$0xff]  ;;  %989 = vmatpush.msra.mxu0 %v363_v21 }
  0x91   :  { %4000 = vst [vmem:[#allocation18_spill] sm:$0xff] %v2847_v63  ;;  %1184 = vmatpush.msra.mxu3 %v459_v22  ;;  %v361_v22 = vld [vmem:[%s3954_s0 + $0x2b8] sm:$0xff] }
  0x92   :  { %524 = vmatmul.f32.gmra.mxu0 %v2807_v42 }
  0x93   :  { %654 = vmatmul.f32.gmra.mxu2 %v2810_v50  ;;  %719 = vmatmul.f32.gmra.mxu3 %v2813_v38  ;;  %v2841_v38 = vmul.f32 %v2244_v58, %v159_v39  ;;  %v2853_v50 = vmul.f32 %v2271_v6, %v160_v43  ;;  %v397_v58 = vld [vmem:[%s3954_s0 + $0x3d8] sm:$0xff]  ;;  %v74_v6 = vunpack.c.h.bf16 %v22_v23  ;;  %v2869_v39 = vperm.slane %v2220_v49, 5  ;;  %v25_v23 = vld [vmem:[%s3956_s2 + $0x28] sm:$0xff] }
  0x94   :  { %1053 = vmatpush.msra.mxu1 %v397_v58  ;;  %v2878_v43 = vmul.f32 %v2860_v62, %v73_v25  ;;  %v395_v58 = vld [vmem:[%s3954_s0 + $0x3c8] sm:$0xff]  ;;  %v425_v25 = vld [vmem:[%s3954_s0 + $0x4b8] sm:$0xff]  ;;  %v80_v21 = vunpack.c.h.bf16 %v25_v23  ;;  %990 = vmatpush.msra.mxu0 %v361_v22 }
  0x95   :  { %589 = vmatmul.f32.gmra.mxu1 %v2822_v26  ;;  %v2884_v49 = vmul.f32 %v2869_v39, %v74_v6  ;;  %1120 = vmatpush.msra.mxu2 %v425_v25  ;;  %v359_v22 = vld [vmem:[%s3954_s0 + $0x2a8] sm:$0xff] }
  0x96   :  { %1054 = vmatpush.msra.mxu1 %v395_v58  ;;  %v457_v58 = vld [vmem:[%s3954_s0 + $0x5b8] sm:$0xff]  ;;  %v2911_v60 = vmul.f32 %v2869_v39, %v80_v21  ;;  %991 = vmatpush.msra.mxu0 %v359_v22 }
  0x97   :  { %1185 = vmatpush.msra.mxu3 %v457_v58 }
  0x98   :  { %1055 = vmatpush.msra.mxu1 %v393_v59  ;;  %v455_v59 = vld [vmem:[%s3954_s0 + $0x5a8] sm:$0xff] }
  0x99   :  { %1186 = vmatpush.msra.mxu3 %v455_v59  ;;  %v357_v59 = vld [vmem:[%s3954_s0 + $0x298] sm:$0xff] }
  0x9a   :  { %527 = vmatmul.f32.gmra.mxu0 %v2841_v38 }
  0x9b   :  { %657 = vmatmul.f32.gmra.mxu2 %v2844_v51  ;;  %722 = vmatmul.f32.gmra.mxu3 %v2847_v63  ;;  %v79_v63 = vunpack.c.l.bf16 %v25_v23  ;;  %v28_v23 = vld [vmem:[%s3956_s2 + $0x40] sm:$0xff] }
  0x9c   :  { %v86_v21 = vunpack.c.h.bf16 %v28_v23  ;;  %992 = vmatpush.msra.mxu0 %v357_v59 }
  0x9d   :  { %592 = vmatmul.f32.gmra.mxu1 %v2853_v50 }
  0x9f   :  { %v483_v3 = vpop.f32.mrf.mxu0 }
  0xa2   :  { %v548_v0 = vpop.f32.mrf.mxu1  ;;  %742 = vmatmul.f32.vlgmr.msrb.gmra.mxu0 %v2878_v43 }
  0xa3   :  { %872 = vmatmul.f32.vlgmr.msrb.gmra.mxu2 %v2280_v9  ;;  %937 = vmatmul.f32.vlgmr.msrb.gmra.mxu3 %v2304_v17  ;;  %v549_v6 = vadd.f32 %v548_v0, %v483_v3  ;;  %v2903_v17 = vmul.f32 %v2860_v62, %v79_v63  ;;  %v85_v63 = vunpack.c.l.bf16 %v28_v23  ;;  %v2938_v23 = vmul.f32 %v2869_v39, %v86_v21 }
  0xa5   :  { %807 = vmatmul.f32.vlgmr.msrb.gmra.mxu1 %v2884_v49 }
  0xa6   :  { %v613_v9 = vpop.f32.mrf.mxu2  ;;  %v678_v51 = vpop.f32.mrf.mxu3 }
  0xa7   :  { %v614_v25 = vadd.f32 %v613_v9, %v549_v6  ;;  %v486_v3 = vpop.f32.mrf.mxu0 }
  0xa9   :  { %v2908_v0 = vadd.f32 %v678_v51, %v614_v25  ;;  %v423_v51 = vld [vmem:[%s3954_s0 + $0x4a8] sm:$0xff]  ;;  %v31_v25 = vld [vmem:[%s3956_s2 + $0x58] sm:$0xff] }
  0xaa   :  { %v551_v35 = vpop.f32.mrf.mxu1  ;;  %745 = vmatmul.f32.gmra.mxu0 %v2903_v17  ;;  %1121 = vmatpush.msra.mxu2 %v423_v51  ;;  %v391_v51 = vld [vmem:[%s3954_s0 + $0x3a8] sm:$0xff]  ;;  %v92_v22 = vunpack.c.h.bf16 %v31_v25 }
  0xab   :  { %4001 = vst [vmem:[#allocation19_spill] sm:$0xff] %v2908_v0  ;;  %875 = vmatmul.f32.gmra.mxu2 %v2332_v29  ;;  %940 = vmatmul.f32.gmra.mxu3 %v2356_v37  ;;  %v552_v6 = vadd.f32 %v551_v35, %v486_v3  ;;  %v2930_v37 = vmul.f32 %v2860_v62, %v85_v63  ;;  %v91_v63 = vunpack.c.l.bf16 %v31_v25 }
  0xac   :  { %1056 = vmatpush.msra.mxu1 %v391_v51  ;;  %v2965_v51 = vmul.f32 %v2869_v39, %v92_v22 }
  0xad   :  { %810 = vmatmul.f32.gmra.mxu1 %v2911_v60 }
  0xae   :  { %v616_v29 = vpop.f32.mrf.mxu2  ;;  %v681_v58 = vpop.f32.mrf.mxu3 }
  0xaf   :  { %v617_v9 = vadd.f32 %v616_v29, %v552_v6  ;;  %v489_v35 = vpop.f32.mrf.mxu0  ;;  %v421_v6 = vld [vmem:[%s3954_s0 + $0x498] sm:$0xff] }
  0xb0   :  { %1122 = vmatpush.msra.mxu2 %v421_v6  ;;  %v453_v29 = vld [vmem:[%s3954_s0 + $0x598] sm:$0xff] }
  0xb1   :  { %v2935_v3 = vadd.f32 %v681_v58, %v617_v9  ;;  %1187 = vmatpush.msra.mxu3 %v453_v29  ;;  %v389_v6 = vld [vmem:[%s3954_s0 + $0x398] sm:$0xff]  ;;  %v355_v29 = vld [vmem:[%s3954_s0 + $0x288] sm:$0xff] }
  0xb2   :  { %v554_v0 = vpop.f32.mrf.mxu1  ;;  %748 = vmatmul.f32.gmra.mxu0 %v2930_v37  ;;  %1057 = vmatpush.msra.mxu1 %v389_v6 }
  0xb3   :  { %4002 = vst [vmem:[#allocation20_spill] sm:$0xff] %v2935_v3  ;;  %878 = vmatmul.f32.gmra.mxu2 %v2390_v52  ;;  %943 = vmatmul.f32.gmra.mxu3 %v2414_v61  ;;  %v555_v21 = vadd.f32 %v554_v0, %v489_v35  ;;  %v2957_v61 = vmul.f32 %v2860_v62, %v91_v63  ;;  %v34_v35 = vld [vmem:[%s3956_s2 + $0x70] sm:$0xff] }
  0xb4   :  { %v97_v63 = vunpack.c.l.bf16 %v34_v35  ;;  %v98_v59 = vunpack.c.h.bf16 %v34_v35  ;;  %993 = vmatpush.msra.mxu0 %v355_v29 }
  0xb5   :  { %813 = vmatmul.f32.gmra.mxu1 %v2938_v23 }
  0xb6   :  { %v619_v52 = vpop.f32.mrf.mxu2  ;;  %v684_v58 = vpop.f32.mrf.mxu3  ;;  %v2992_v6 = vmul.f32 %v2869_v39, %v98_v59 }
  0xb7   :  { %v620_v9 = vadd.f32 %v619_v52, %v555_v21  ;;  %v492_v0 = vpop.f32.mrf.mxu0  ;;  %v419_v21 = vld [vmem:[%s3954_s0 + $0x488] sm:$0xff] }
  0xb8   :  { %1123 = vmatpush.msra.mxu2 %v419_v21  ;;  %v451_v52 = vld [vmem:[%s3954_s0 + $0x588] sm:$0xff] }
  0xb9   :  { %v2962_v25 = vadd.f32 %v684_v58, %v620_v9  ;;  %1188 = vmatpush.msra.mxu3 %v451_v52  ;;  %v387_v21 = vld [vmem:[%s3954_s0 + $0x388] sm:$0xff]  ;;  %v353_v52 = vld [vmem:[%s3954_s0 + $0x278] sm:$0xff] }
  0xba   :  { %v557_v3 = vpop.f32.mrf.mxu1  ;;  %751 = vmatmul.f32.gmra.mxu0 %v2957_v61  ;;  %1058 = vmatpush.msra.mxu1 %v387_v21 }
  0xbb   :  { %4003 = vst [vmem:[#allocation21_spill] sm:$0xff] %v2962_v25  ;;  %881 = vmatmul.f32.gmra.mxu2 %v2436_v13  ;;  %946 = vmatmul.f32.gmra.mxu3 %v2451_v19  ;;  %v558_v22 = vadd.f32 %v557_v3, %v492_v0  ;;  %v2984_v19 = vmul.f32 %v2860_v62, %v97_v63  ;;  %v37_v0 = vld [vmem:[%s3956_s2 + $0x88] sm:$0xff] }
  0xbc   :  { %v103_v63 = vunpack.c.l.bf16 %v37_v0  ;;  %v104_v29 = vunpack.c.h.bf16 %v37_v0  ;;  %994 = vmatpush.msra.mxu0 %v353_v52 }
  0xbd   :  { %816 = vmatmul.f32.gmra.mxu1 %v2965_v51 }
  0xbe   :  { %v622_v13 = vpop.f32.mrf.mxu2  ;;  %v687_v58 = vpop.f32.mrf.mxu3  ;;  %v3019_v21 = vmul.f32 %v2869_v39, %v104_v29 }
  0xbf   :  { %v623_v9 = vadd.f32 %v622_v13, %v558_v22  ;;  %v495_v3 = vpop.f32.mrf.mxu0  ;;  %v417_v22 = vld [vmem:[%s3954_s0 + $0x478] sm:$0xff] }
  0xc0   :  { %1124 = vmatpush.msra.mxu2 %v417_v22  ;;  %v449_v13 = vld [vmem:[%s3954_s0 + $0x578] sm:$0xff] }
  0xc1   :  { %v2989_v35 = vadd.f32 %v687_v58, %v623_v9  ;;  %1189 = vmatpush.msra.mxu3 %v449_v13  ;;  %v385_v22 = vld [vmem:[%s3954_s0 + $0x378] sm:$0xff]  ;;  %v351_v13 = vld [vmem:[%s3954_s0 + $0x268] sm:$0xff] }
  0xc2   :  { %v560_v25 = vpop.f32.mrf.mxu1  ;;  %754 = vmatmul.f32.gmra.mxu0 %v2984_v19  ;;  %1059 = vmatpush.msra.mxu1 %v385_v22 }
  0xc3   :  { %4004 = vst [vmem:[#allocation22_spill] sm:$0xff] %v2989_v35  ;;  %884 = vmatmul.f32.gmra.mxu2 %v2470_v28  ;;  %949 = vmatmul.f32.gmra.mxu3 %v2485_v36  ;;  %v561_v59 = vadd.f32 %v560_v25, %v495_v3  ;;  %v3011_v36 = vmul.f32 %v2860_v62, %v103_v63  ;;  %v40_v3 = vld [vmem:[%s3956_s2 + $0xa0] sm:$0xff] }
  0xc4   :  { %v109_v63 = vunpack.c.l.bf16 %v40_v3  ;;  %v110_v52 = vunpack.c.h.bf16 %v40_v3  ;;  %995 = vmatpush.msra.mxu0 %v351_v13 }
  0xc5   :  { %819 = vmatmul.f32.gmra.mxu1 %v2992_v6 }
  0xc6   :  { %v625_v28 = vpop.f32.mrf.mxu2  ;;  %v690_v58 = vpop.f32.mrf.mxu3  ;;  %v3046_v22 = vmul.f32 %v2869_v39, %v110_v52 }
  0xc7   :  { %v626_v9 = vadd.f32 %v625_v28, %v561_v59  ;;  %v498_v25 = vpop.f32.mrf.mxu0  ;;  %v415_v59 = vld [vmem:[%s3954_s0 + $0x468] sm:$0xff] }
  0xc8   :  { %1125 = vmatpush.msra.mxu2 %v415_v59  ;;  %v447_v28 = vld [vmem:[%s3954_s0 + $0x568] sm:$0xff] }
  0xc9   :  { %v3016_v0 = vadd.f32 %v690_v58, %v626_v9  ;;  %1190 = vmatpush.msra.mxu3 %v447_v28  ;;  %v383_v59 = vld [vmem:[%s3954_s0 + $0x368] sm:$0xff]  ;;  %v349_v28 = vld [vmem:[%s3954_s0 + $0x258] sm:$0xff] }
  0xca   :  { %v563_v35 = vpop.f32.mrf.mxu1  ;;  %757 = vmatmul.f32.gmra.mxu0 %v3011_v36  ;;  %1060 = vmatpush.msra.mxu1 %v383_v59 }
  0xcb   :  { %4005 = vst [vmem:[#allocation23_spill] sm:$0xff] %v3016_v0  ;;  %887 = vmatmul.f32.gmra.mxu2 %v2504_v46  ;;  %952 = vmatmul.f32.gmra.mxu3 %v2519_v53  ;;  %v564_v29 = vadd.f32 %v563_v35, %v498_v25  ;;  %v3038_v53 = vmul.f32 %v2860_v62, %v109_v63  ;;  %v43_v25 = vld [vmem:[%s3956_s2 + $0xb8] sm:$0xff] }
  0xcc   :  { %v115_v63 = vunpack.c.l.bf16 %v43_v25  ;;  %v116_v13 = vunpack.c.h.bf16 %v43_v25  ;;  %996 = vmatpush.msra.mxu0 %v349_v28 }
  0xcd   :  { %822 = vmatmul.f32.gmra.mxu1 %v3019_v21 }
  0xce   :  { %v628_v46 = vpop.f32.mrf.mxu2  ;;  %v693_v58 = vpop.f32.mrf.mxu3  ;;  %v3073_v59 = vmul.f32 %v2869_v39, %v116_v13 }
  0xcf   :  { %v629_v9 = vadd.f32 %v628_v46, %v564_v29  ;;  %v501_v35 = vpop.f32.mrf.mxu0  ;;  %v413_v29 = vld [vmem:[%s3954_s0 + $0x458] sm:$0xff] }
  0xd0   :  { %1126 = vmatpush.msra.mxu2 %v413_v29  ;;  %v445_v46 = vld [vmem:[%s3954_s0 + $0x558] sm:$0xff] }
  0xd1   :  { %v3043_v3 = vadd.f32 %v693_v58, %v629_v9  ;;  %1191 = vmatpush.msra.mxu3 %v445_v46  ;;  %v381_v29 = vld [vmem:[%s3954_s0 + $0x358] sm:$0xff]  ;;  %v347_v46 = vld [vmem:[%s3954_s0 + $0x248] sm:$0xff] }
  0xd2   :  { %v566_v0 = vpop.f32.mrf.mxu1  ;;  %760 = vmatmul.f32.gmra.mxu0 %v3038_v53  ;;  %1061 = vmatpush.msra.mxu1 %v381_v29 }
  0xd3   :  { %4006 = vst [vmem:[#allocation24_spill] sm:$0xff] %v3043_v3  ;;  %890 = vmatmul.f32.gmra.mxu2 %v2538_v4  ;;  %955 = vmatmul.f32.gmra.mxu3 %v2553_v16  ;;  %v567_v52 = vadd.f32 %v566_v0, %v501_v35  ;;  %v3065_v16 = vmul.f32 %v2860_v62, %v115_v63  ;;  %v46_v35 = vld [vmem:[%s3956_s2 + $0xd0] sm:$0xff] }
  0xd4   :  { %v121_v63 = vunpack.c.l.bf16 %v46_v35  ;;  %v122_v28 = vunpack.c.h.bf16 %v46_v35  ;;  %997 = vmatpush.msra.mxu0 %v347_v46 }
  0xd5   :  { %825 = vmatmul.f32.gmra.mxu1 %v3046_v22 }
  0xd6   :  { %v631_v4 = vpop.f32.mrf.mxu2  ;;  %v696_v58 = vpop.f32.mrf.mxu3  ;;  %v3100_v29 = vmul.f32 %v2869_v39, %v122_v28 }
  0xd7   :  { %v632_v9 = vadd.f32 %v631_v4, %v567_v52  ;;  %v504_v0 = vpop.f32.mrf.mxu0  ;;  %v411_v52 = vld [vmem:[%s3954_s0 + $0x448] sm:$0xff] }
  0xd8   :  { %1127 = vmatpush.msra.mxu2 %v411_v52  ;;  %v443_v4 = vld [vmem:[%s3954_s0 + $0x548] sm:$0xff] }
  0xd9   :  { %v3070_v25 = vadd.f32 %v696_v58, %v632_v9  ;;  %1192 = vmatpush.msra.mxu3 %v443_v4  ;;  %v379_v52 = vld [vmem:[%s3954_s0 + $0x348] sm:$0xff]  ;;  %v345_v4 = vld [vmem:[%s3954_s0 + $0x238] sm:$0xff] }
  0xda   :  { %v569_v3 = vpop.f32.mrf.mxu1  ;;  %763 = vmatmul.f32.gmra.mxu0 %v3065_v16  ;;  %1062 = vmatpush.msra.mxu1 %v379_v52 }
  0xdb   :  { %4007 = vst [vmem:[#allocation25_spill] sm:$0xff] %v3070_v25  ;;  %893 = vmatmul.f32.gmra.mxu2 %v2572_v27  ;;  %958 = vmatmul.f32.gmra.mxu3 %v2587_v40  ;;  %v570_v13 = vadd.f32 %v569_v3, %v504_v0  ;;  %v3092_v40 = vmul.f32 %v2860_v62, %v121_v63  ;;  %v49_v0 = vld [vmem:[%s3956_s2 + $0xe8] sm:$0xff] }
  0xdc   :  { %v127_v63 = vunpack.c.l.bf16 %v49_v0  ;;  %v128_v46 = vunpack.c.h.bf16 %v49_v0  ;;  %998 = vmatpush.msra.mxu0 %v345_v4 }
  0xdd   :  { %828 = vmatmul.f32.gmra.mxu1 %v3073_v59 }
  0xde   :  { %v634_v27 = vpop.f32.mrf.mxu2  ;;  %v699_v58 = vpop.f32.mrf.mxu3  ;;  %v3127_v52 = vmul.f32 %v2869_v39, %v128_v46 }
  0xdf   :  { %v635_v9 = vadd.f32 %v634_v27, %v570_v13  ;;  %v507_v3 = vpop.f32.mrf.mxu0  ;;  %v409_v13 = vld [vmem:[%s3954_s0 + $0x438] sm:$0xff] }
  0xe0   :  { %1128 = vmatpush.msra.mxu2 %v409_v13  ;;  %v441_v27 = vld [vmem:[%s3954_s0 + $0x538] sm:$0xff]  ;;  %4009 = vst [vmem:[#allocation27_spill] sm:$0xff] %v3127_v52 }
  0xe1   :  { %v3097_v35 = vadd.f32 %v699_v58, %v635_v9  ;;  %1193 = vmatpush.msra.mxu3 %v441_v27  ;;  %v377_v13 = vld [vmem:[%s3954_s0 + $0x338] sm:$0xff]  ;;  %v343_v27 = vld [vmem:[%s3954_s0 + $0x228] sm:$0xff] }
  0xe2   :  { %v572_v25 = vpop.f32.mrf.mxu1  ;;  %766 = vmatmul.f32.gmra.mxu0 %v3092_v40  ;;  %1063 = vmatpush.msra.mxu1 %v377_v13 }
  0xe3   :  { %4008 = vst [vmem:[#allocation26_spill] sm:$0xff] %v3097_v35  ;;  %896 = vmatmul.f32.gmra.mxu2 %v2606_v57  ;;  %961 = vmatmul.f32.gmra.mxu3 %v2621_v2  ;;  %v573_v28 = vadd.f32 %v572_v25, %v507_v3  ;;  %v3119_v2 = vmul.f32 %v2860_v62, %v127_v63  ;;  %v52_v3 = vld [vmem:[%s3956_s2 + $0x100] sm:$0xff] }
  0xe4   :  { %v133_v63 = vunpack.c.l.bf16 %v52_v3  ;;  %v134_v4 = vunpack.c.h.bf16 %v52_v3  ;;  %999 = vmatpush.msra.mxu0 %v343_v27 }
  0xe5   :  { %831 = vmatmul.f32.gmra.mxu1 %v3100_v29 }
  0xe6   :  { %v637_v57 = vpop.f32.mrf.mxu2  ;;  %v702_v58 = vpop.f32.mrf.mxu3  ;;  %v3154_v13 = vmul.f32 %v2869_v39, %v134_v4 }
  0xe7   :  { %v638_v9 = vadd.f32 %v637_v57, %v573_v28  ;;  %v510_v25 = vpop.f32.mrf.mxu0  ;;  %v407_v28 = vld [vmem:[%s3954_s0 + $0x428] sm:$0xff] }
  0xe8   :  { %1129 = vmatpush.msra.mxu2 %v407_v28  ;;  %v439_v57 = vld [vmem:[%s3954_s0 + $0x528] sm:$0xff]  ;;  %4010 = vst [vmem:[#allocation28_spill] sm:$0xff] %v3154_v13 }
  0xe9   :  { %v3124_v0 = vadd.f32 %v702_v58, %v638_v9  ;;  %1194 = vmatpush.msra.mxu3 %v439_v57  ;;  %v375_v28 = vld [vmem:[%s3954_s0 + $0x328] sm:$0xff]  ;;  %v341_v57 = vld [vmem:[%s3954_s0 + $0x218] sm:$0xff] }
  0xea   :  { %v575_v35 = vpop.f32.mrf.mxu1  ;;  %769 = vmatmul.f32.gmra.mxu0 %v3119_v2  ;;  %1064 = vmatpush.msra.mxu1 %v375_v28 }
  0xeb   :  { %899 = vmatmul.f32.gmra.mxu2 %v2640_v24  ;;  %964 = vmatmul.f32.gmra.mxu3 %v2655_v41  ;;  %v576_v46 = vadd.f32 %v575_v35, %v510_v25  ;;  %v3146_v41 = vmul.f32 %v2860_v62, %v133_v63  ;;  %v55_v25 = vld [vmem:[%s3956_s2 + $0x118] sm:$0xff] }
  0xec   :  { %v139_v63 = vunpack.c.l.bf16 %v55_v25  ;;  %v140_v27 = vunpack.c.h.bf16 %v55_v25  ;;  %1000 = vmatpush.msra.mxu0 %v341_v57 }
  0xed   :  { %834 = vmatmul.f32.gmra.mxu1 %v3127_v52 }
  0xee   :  { %v640_v24 = vpop.f32.mrf.mxu2  ;;  %v705_v58 = vpop.f32.mrf.mxu3  ;;  %v3181_v28 = vmul.f32 %v2869_v39, %v140_v27 }
  0xef   :  { %v641_v9 = vadd.f32 %v640_v24, %v576_v46  ;;  %v513_v35 = vpop.f32.mrf.mxu0  ;;  %v405_v46 = vld [vmem:[%s3954_s0 + $0x418] sm:$0xff] }
  0xf0   :  { %1130 = vmatpush.msra.mxu2 %v405_v46  ;;  %v437_v24 = vld [vmem:[%s3954_s0 + $0x518] sm:$0xff]  ;;  %4011 = vst [vmem:[#allocation29_spill] sm:$0xff] %v3181_v28 }
  0xf1   :  { %v3151_v3 = vadd.f32 %v705_v58, %v641_v9  ;;  %1195 = vmatpush.msra.mxu3 %v437_v24  ;;  %v373_v46 = vld [vmem:[%s3954_s0 + $0x318] sm:$0xff]  ;;  %v339_v24 = vld [vmem:[%s3954_s0 + $0x208] sm:$0xff] }
  0xf2   :  { %v578_v52 = vpop.f32.mrf.mxu1  ;;  %772 = vmatmul.f32.gmra.mxu0 %v3146_v41  ;;  %1065 = vmatpush.msra.mxu1 %v373_v46 }
  0xf3   :  { %902 = vmatmul.f32.gmra.mxu2 %v2674_v1  ;;  %967 = vmatmul.f32.gmra.mxu3 %v2689_v20  ;;  %v579_v4 = vadd.f32 %v578_v52, %v513_v35  ;;  %v3173_v20 = vmul.f32 %v2860_v62, %v139_v63  ;;  %v58_v35 = vld [vmem:[%s3956_s2 + $0x130] sm:$0xff] }
  0xf4   :  { %v145_v63 = vunpack.c.l.bf16 %v58_v35  ;;  %v146_v57 = vunpack.c.h.bf16 %v58_v35  ;;  %1001 = vmatpush.msra.mxu0 %v339_v24 }
  0xf5   :  { %837 = vmatmul.f32.gmra.mxu1 %v3154_v13 }
  0xf6   :  { %v643_v1 = vpop.f32.mrf.mxu2  ;;  %v708_v58 = vpop.f32.mrf.mxu3  ;;  %v3208_v46 = vmul.f32 %v2869_v39, %v146_v57 }
  0xf7   :  { %v644_v9 = vadd.f32 %v643_v1, %v579_v4  ;;  %v516_v52 = vpop.f32.mrf.mxu0  ;;  %v403_v4 = vld [vmem:[%s3954_s0 + $0x408] sm:$0xff] }
  0xf8   :  { %1131 = vmatpush.msra.mxu2 %v403_v4  ;;  %v435_v1 = vld [vmem:[%s3954_s0 + $0x508] sm:$0xff] }
  0xf9   :  { %v3178_v25 = vadd.f32 %v708_v58, %v644_v9  ;;  %1196 = vmatpush.msra.mxu3 %v435_v1  ;;  %v371_v4 = vld [vmem:[%s3954_s0 + $0x308] sm:$0xff] }
  0xfa   :  { %v581_v13 = vpop.f32.mrf.mxu1  ;;  %775 = vmatmul.f32.gmra.mxu0 %v3173_v20  ;;  %1066 = vmatpush.msra.mxu1 %v371_v4 }
  0xfb   :  { %905 = vmatmul.f32.gmra.mxu2 %v2708_v45  ;;  %970 = vmatmul.f32.gmra.mxu3 %v2723_v10  ;;  %v582_v27 = vadd.f32 %v581_v13, %v516_v52  ;;  %v3200_v10 = vmul.f32 %v2860_v62, %v145_v63  ;;  %v61_v52 = vld [vmem:[%s3956_s2 + $0x148] sm:$0xff] }
  0xfc   :  { %v151_v63 = vunpack.c.l.bf16 %v61_v52  ;;  %v152_v24 = vunpack.c.h.bf16 %v61_v52 }
  0xfd   :  { %840 = vmatmul.f32.gmra.mxu1 %v3181_v28  ;;  %4012 = vst [vmem:[#allocation30_spill] sm:$0xff] %v3200_v10 }
  0xfe   :  { %v646_v45 = vpop.f32.mrf.mxu2  ;;  %v711_v58 = vpop.f32.mrf.mxu3 }
  0xff   :  { %v647_v9 = vadd.f32 %v646_v45, %v582_v27  ;;  %v519_v13 = vpop.f32.mrf.mxu0  ;;  %v3218_v45 = vmul.f32 %v2860_v62, %v151_v63 }
 0x101   :  { %v3205_v35 = vadd.f32 %v711_v58, %v647_v9  ;;  %4013 = vst [vmem:[#allocation31_spill] sm:$0xff] %v3218_v45 }
 0x102   :  { %v584_v28 = vpop.f32.mrf.mxu1  ;;  %778 = vmatmul.f32.gmra.mxu0 %v3200_v10  ;;  %v64_v10 = vld [vmem:[%s3956_s2 + $0x160] sm:$0xff] }
 0x103   :  { %908 = vmatmul.f32.gmra.mxu2 %v2742_v44  ;;  %973 = vmatmul.f32.gmra.mxu3 %v2757_v18  ;;  %v585_v27 = vadd.f32 %v584_v28, %v519_v13  ;;  %v3226_v44 = vmul.f32 %v2869_v39, %v152_v24  ;;  %v157_v28 = vunpack.c.l.bf16 %v64_v10  ;;  %v158_v52 = vunpack.c.h.bf16 %v64_v10 }
 0x105   :  { %843 = vmatmul.f32.gmra.mxu1 %v3208_v46  ;;  %4014 = vst [vmem:[#allocation32_spill] sm:$0xff] %v3226_v44 }
 0x106   :  { %v649_v1 = vpop.f32.mrf.mxu2  ;;  %v714_v57 = vpop.f32.mrf.mxu3 }
 0x107   :  { %v650_v58 = vadd.f32 %v649_v1, %v585_v27  ;;  %v522_v9 = vpop.f32.mrf.mxu0  ;;  %v3233_v1 = vmul.f32 %v2860_v62, %v157_v28 }
 0x109   :  { %v3223_v4 = vadd.f32 %v714_v57, %v650_v58  ;;  %4015 = vst [vmem:[#allocation33_spill] sm:$0xff] %v3233_v1  ;;  %v67_v58 = vld [vmem:[%s3956_s2 + $0x178] sm:$0xff] }
 0x10a   :  { %v587_v18 = vpop.f32.mrf.mxu1  ;;  %781 = vmatmul.f32.gmra.mxu0 %v3218_v45  ;;  %v163_v10 = vunpack.c.l.bf16 %v67_v58 }
 0x10b   :  { %911 = vmatmul.f32.gmra.mxu2 %v2773_v54  ;;  %976 = vmatmul.f32.gmra.mxu3 %v2788_v8  ;;  %v588_v13 = vadd.f32 %v587_v18, %v522_v9  ;;  %v3241_v54 = vmul.f32 %v2869_v39, %v158_v52  ;;  %v164_v18 = vunpack.c.h.bf16 %v67_v58 }
 0x10d   :  { %846 = vmatmul.f32.gmra.mxu1 %v3226_v44 }
 0x10e   :  { %v652_v63 = vpop.f32.mrf.mxu2  ;;  %v717_v27 = vpop.f32.mrf.mxu3 }
 0x10f   :  { %v653_v57 = vadd.f32 %v652_v63, %v588_v13  ;;  %v525_v24 = vpop.f32.mrf.mxu0  ;;  %v3248_v63 = vmul.f32 %v2860_v62, %v163_v10 }
 0x111   :  { %v3238_v45 = vadd.f32 %v717_v27, %v653_v57 }
 0x112   :  { %v590_v8 = vpop.f32.mrf.mxu1  ;;  %784 = vmatmul.f32.gmra.mxu0 %v3233_v1  ;;  %v3253_v1 = vmul.f32 %v2869_v39, %v164_v18 }
 0x113   :  { %914 = vmatmul.f32.gmra.mxu2 %v2807_v42  ;;  %979 = vmatmul.f32.gmra.mxu3 %v2822_v26  ;;  %v591_v9 = vadd.f32 %v590_v8, %v525_v24 }
 0x115   :  { %849 = vmatmul.f32.gmra.mxu1 %v3241_v54 }
 0x116   :  { %v655_v28 = vpop.f32.mrf.mxu2  ;;  %v720_v13 = vpop.f32.mrf.mxu3 }
 0x117   :  { %v656_v27 = vadd.f32 %v655_v28, %v591_v9  ;;  %v528_v52 = vpop.f32.mrf.mxu0 }
 0x119   :  { %v3250_v57 = vadd.f32 %v720_v13, %v656_v27 }
 0x11a   :  { %v593_v44 = vpop.f32.mrf.mxu1  ;;  %787 = vmatmul.f32.gmra.mxu0 %v3248_v63 }
 0x11b   :  { %917 = vmatmul.f32.gmra.mxu2 %v2841_v38  ;;  %982 = vmatmul.f32.gmra.mxu3 %v2853_v50  ;;  %v594_v26 = vadd.f32 %v593_v44, %v528_v52 }
 0x11d   :  { %852 = vmatmul.f32.gmra.mxu1 %v3253_v1 }
 0x11e   :  { %v658_v42 = vpop.f32.mrf.mxu2  ;;  %v723_v62 = vpop.f32.mrf.mxu3 }
 0x11f   :  { %v659_v24 = vadd.f32 %v658_v42, %v594_v26  ;;  %v3259_v58 = vpop.f32.mrf.mxu0 }
 0x121   :  { %v3261_v8 = vadd.f32 %v723_v62, %v659_v24 }
 0x122   :  { %v3263_v10 = vpop.f32.mrf.mxu1  ;;  %1002 = vmatmul.f32.vlgmr.msra.gmra.mxu0 %v2286_v11 }
 0x123   :  { %1132 = vmatmul.f32.vlgmr.msra.gmra.mxu2 %v2878_v43  ;;  %1197 = vmatmul.f32.vlgmr.msra.gmra.mxu3 %v2884_v49 }
 0x125   :  { %1067 = vmatmul.f32.vlgmr.msra.gmra.mxu1 %v2289_v12 }
 0x126   :  { %v873_v50 = vpop.f32.mrf.mxu2  ;;  %v938_v38 = vpop.f32.mrf.mxu3 }
 0x127   :  { %v3269_v39 = vadd.f32 %v938_v38, %v873_v50  ;;  %v3271_v44 = vpop.f32.mrf.mxu0  ;;  %v4017_v50 = vld [vmem:[#allocation3_spill] sm:$0xff] }
 0x12a   :  { %v3273_v9 = vpop.f32.mrf.mxu1  ;;  %1005 = vmatmul.f32.gmra.mxu0 %v2341_v32 }
 0x12b   :  { %1135 = vmatmul.f32.gmra.mxu2 %v2903_v17  ;;  %1200 = vmatmul.f32.gmra.mxu3 %v2911_v60 }
 0x12d   :  { %1070 = vmatmul.f32.gmra.mxu1 %v2344_v33 }
 0x12e   :  { %v876_v11 = vpop.f32.mrf.mxu2  ;;  %v941_v43 = vpop.f32.mrf.mxu3 }
 0x12f   :  { %v3279_v49 = vadd.f32 %v941_v43, %v876_v11  ;;  %v3281_v12 = vpop.f32.mrf.mxu0 }
 0x132   :  { %v3283_v18 = vpop.f32.mrf.mxu1  ;;  %1008 = vmatmul.f32.gmra.mxu0 %v2399_v55 }
 0x133   :  { %1138 = vmatmul.f32.gmra.mxu2 %v2930_v37  ;;  %1203 = vmatmul.f32.gmra.mxu3 %v2938_v23 }
 0x135   :  { %1073 = vmatmul.f32.gmra.mxu1 %v2402_v56 }
 0x136   :  { %v879_v32 = vpop.f32.mrf.mxu2  ;;  %v944_v60 = vpop.f32.mrf.mxu3 }
 0x137   :  { %v3289_v17 = vadd.f32 %v944_v60, %v879_v32  ;;  %v3291_v33 = vpop.f32.mrf.mxu0 }
 0x13a   :  { %v3293_v28 = vpop.f32.mrf.mxu1  ;;  %1011 = vmatmul.f32.gmra.mxu0 %v2439_v14 }
 0x13b   :  { %1141 = vmatmul.f32.gmra.mxu2 %v2957_v61  ;;  %1206 = vmatmul.f32.gmra.mxu3 %v2965_v51 }
 0x13d   :  { %1076 = vmatmul.f32.gmra.mxu1 %v2442_v15 }
 0x13e   :  { %v882_v55 = vpop.f32.mrf.mxu2  ;;  %v947_v37 = vpop.f32.mrf.mxu3 }
 0x13f   :  { %v3299_v23 = vadd.f32 %v947_v37, %v882_v55  ;;  %v3301_v56 = vpop.f32.mrf.mxu0  ;;  %v4020_v37 = vld [vmem:[#allocation27_spill] sm:$0xff] }
 0x142   :  { %v3303_v13 = vpop.f32.mrf.mxu1  ;;  %1014 = vmatmul.f32.gmra.mxu0 %v2473_v30 }
 0x143   :  { %1144 = vmatmul.f32.gmra.mxu2 %v2984_v19  ;;  %1209 = vmatmul.f32.gmra.mxu3 %v2992_v6 }
 0x145   :  { %1079 = vmatmul.f32.gmra.mxu1 %v2476_v31 }
 0x146   :  { %v885_v14 = vpop.f32.mrf.mxu2  ;;  %v950_v61 = vpop.f32.mrf.mxu3 }
 0x147   :  { %v3309_v51 = vadd.f32 %v950_v61, %v885_v14  ;;  %v3311_v15 = vpop.f32.mrf.mxu0 }
 0x14a   :  { %v3313_v27 = vpop.f32.mrf.mxu1  ;;  %1017 = vmatmul.f32.gmra.mxu0 %v2507_v47 }
 0x14b   :  { %1147 = vmatmul.f32.gmra.mxu2 %v3011_v36  ;;  %1212 = vmatmul.f32.gmra.mxu3 %v3019_v21 }
 0x14d   :  { %1082 = vmatmul.f32.gmra.mxu1 %v2510_v48 }
 0x14e   :  { %v888_v30 = vpop.f32.mrf.mxu2  ;;  %v953_v19 = vpop.f32.mrf.mxu3 }
 0x14f   :  { %v3319_v6 = vadd.f32 %v953_v19, %v888_v30  ;;  %v3321_v31 = vpop.f32.mrf.mxu0 }
 0x152   :  { %v3323_v52 = vpop.f32.mrf.mxu1  ;;  %1020 = vmatmul.f32.gmra.mxu0 %v2541_v5  ;;  %v4016_v5 = vld [vmem:[#allocation2_spill] sm:$0xff] }
 0x153   :  { %1150 = vmatmul.f32.gmra.mxu2 %v3038_v53  ;;  %1215 = vmatmul.f32.gmra.mxu3 %v3046_v22 }
 0x155   :  { %1085 = vmatmul.f32.gmra.mxu1 %v2544_v7 }
 0x156   :  { %v891_v47 = vpop.f32.mrf.mxu2  ;;  %v956_v36 = vpop.f32.mrf.mxu3 }
 0x157   :  { %v3329_v21 = vadd.f32 %v956_v36, %v891_v47  ;;  %v3331_v48 = vpop.f32.mrf.mxu0 }
 0x15a   :  { %v3333_v26 = vpop.f32.mrf.mxu1  ;;  %1023 = vmatmul.f32.gmra.mxu0 %v2575_v34  ;;  %v4018_v34 = vld [vmem:[#allocation4_spill] sm:$0xff] }
 0x15b   :  { %1153 = vmatmul.f32.gmra.mxu2 %v3065_v16  ;;  %1218 = vmatmul.f32.gmra.mxu3 %v3073_v59 }
 0x15d   :  { %1088 = vmatmul.f32.gmra.mxu1 %v4016_v5  ;;  %v4023_v5 = vld [vmem:[#allocation28_spill] sm:$0xff] }
 0x15e   :  { %v894_v53 = vpop.f32.mrf.mxu2  ;;  %v959_v22 = vpop.f32.mrf.mxu3 }
 0x15f   :  { %v3339_v42 = vadd.f32 %v959_v22, %v894_v53  ;;  %v767_v7 = vpop.f32.mrf.mxu0 }
 0x160   :  { %v768_v62 = vadd.f32 %v767_v7, %v3124_v0  ;;  %v4019_v0 = vld [vmem:[#allocation5_spill] sm:$0xff] }
 0x162   :  { %v832_v24 = vpop.f32.mrf.mxu1  ;;  %1026 = vmatmul.f32.gmra.mxu0 %v4017_v50 }
 0x163   :  { %v3343_v38 = vadd.f32 %v832_v24, %v768_v62  ;;  %1156 = vmatmul.f32.gmra.mxu2 %v3092_v40  ;;  %1221 = vmatmul.f32.gmra.mxu3 %v3100_v29  ;;  %v4021_v40 = vld [vmem:[#allocation6_spill] sm:$0xff] }
 0x165   :  { %1091 = vmatmul.f32.gmra.mxu1 %v4018_v34 }
 0x166   :  { %v897_v16 = vpop.f32.mrf.mxu2  ;;  %v962_v59 = vpop.f32.mrf.mxu3 }
 0x167   :  { %v3348_v11 = vadd.f32 %v962_v59, %v897_v16  ;;  %v770_v43 = vpop.f32.mrf.mxu0  ;;  %v4026_v16 = vld [vmem:[#allocation29_spill] sm:$0xff] }
 0x168   :  { %v771_v32 = vadd.f32 %v770_v43, %v3151_v3  ;;  %v4022_v3 = vld [vmem:[#allocation7_spill] sm:$0xff] }
 0x16a   :  { %v835_v60 = vpop.f32.mrf.mxu1  ;;  %1029 = vmatmul.f32.gmra.mxu0 %v4019_v0 }
 0x16b   :  { %v3352_v55 = vadd.f32 %v835_v60, %v771_v32  ;;  %1159 = vmatmul.f32.gmra.mxu2 %v3119_v2  ;;  %1224 = vmatmul.f32.gmra.mxu3 %v4020_v37  ;;  %v4024_v2 = vld [vmem:[#allocation8_spill] sm:$0xff] }
 0x16d   :  { %1094 = vmatmul.f32.gmra.mxu1 %v4021_v40 }
 0x16e   :  { %v900_v29 = vpop.f32.mrf.mxu2  ;;  %v965_v14 = vpop.f32.mrf.mxu3 }
 0x16f   :  { %v3357_v61 = vadd.f32 %v965_v14, %v900_v29  ;;  %v773_v30 = vpop.f32.mrf.mxu0  ;;  %v4029_v29 = vld [vmem:[#allocation30_spill] sm:$0xff] }
 0x170   :  { %v774_v19 = vadd.f32 %v773_v30, %v3178_v25  ;;  %v4025_v25 = vld [vmem:[#allocation9_spill] sm:$0xff] }
 0x172   :  { %v838_v47 = vpop.f32.mrf.mxu1  ;;  %1032 = vmatmul.f32.gmra.mxu0 %v4022_v3 }
 0x173   :  { %v3361_v36 = vadd.f32 %v838_v47, %v774_v19  ;;  %1162 = vmatmul.f32.gmra.mxu2 %v3146_v41  ;;  %1227 = vmatmul.f32.gmra.mxu3 %v4023_v5  ;;  %v4027_v41 = vld [vmem:[#allocation10_spill] sm:$0xff] }
 0x175   :  { %1097 = vmatmul.f32.gmra.mxu1 %v4024_v2 }
 0x176   :  { %v903_v53 = vpop.f32.mrf.mxu2  ;;  %v968_v22 = vpop.f32.mrf.mxu3 }
 0x177   :  { %v3366_v7 = vadd.f32 %v968_v22, %v903_v53  ;;  %v776_v62 = vpop.f32.mrf.mxu0  ;;  %v4032_v53 = vld [vmem:[#allocation31_spill] sm:$0xff]  ;;  %v4033_v22 = vld [vmem:[#allocation32_spill] sm:$0xff] }
 0x178   :  { %v777_v24 = vadd.f32 %v776_v62, %v3205_v35  ;;  %v4028_v35 = vld [vmem:[#allocation11_spill] sm:$0xff]  ;;  %v4034_v62 = vld [vmem:[#allocation14_spill] sm:$0xff] }
 0x17a   :  { %v841_v50 = vpop.f32.mrf.mxu1  ;;  %1035 = vmatmul.f32.gmra.mxu0 %v4025_v25 }
 0x17b   :  { %v3370_v34 = vadd.f32 %v841_v50, %v777_v24  ;;  %1165 = vmatmul.f32.gmra.mxu2 %v3173_v20  ;;  %1230 = vmatmul.f32.gmra.mxu3 %v4026_v16  ;;  %v4030_v20 = vld [vmem:[#allocation12_spill] sm:$0xff] }
 0x17d   :  { %1100 = vmatmul.f32.gmra.mxu1 %v4027_v41 }
 0x17e   :  { %v906_v59 = vpop.f32.mrf.mxu2  ;;  %v971_v43 = vpop.f32.mrf.mxu3 }
 0x17f   :  { %v3375_v32 = vadd.f32 %v971_v43, %v906_v59  ;;  %v779_v60 = vpop.f32.mrf.mxu0  ;;  %v4036_v43 = vld [vmem:[#allocation33_spill] sm:$0xff] }
 0x180   :  { %v780_v0 = vadd.f32 %v779_v60, %v3223_v4  ;;  %v4031_v4 = vld [vmem:[#allocation13_spill] sm:$0xff]  ;;  %v4037_v60 = vld [vmem:[#allocation16_spill] sm:$0xff] }
 0x182   :  { %v844_v37 = vpop.f32.mrf.mxu1  ;;  %1038 = vmatmul.f32.gmra.mxu0 %v4028_v35 }
 0x183   :  { %v3379_v40 = vadd.f32 %v844_v37, %v780_v0  ;;  %1168 = vmatmul.f32.gmra.mxu2 %v4029_v29  ;;  %1233 = vmatmul.f32.gmra.mxu3 %v3208_v46 }
 0x185   :  { %1103 = vmatmul.f32.gmra.mxu1 %v4030_v20 }
 0x186   :  { %v909_v14 = vpop.f32.mrf.mxu2  ;;  %v974_v30 = vpop.f32.mrf.mxu3 }
 0x187   :  { %v3384_v19 = vadd.f32 %v974_v30, %v909_v14  ;;  %v782_v47 = vpop.f32.mrf.mxu0 }
 0x188   :  { %v783_v3 = vadd.f32 %v782_v47, %v3238_v45  ;;  %v4035_v45 = vld [vmem:[#allocation15_spill] sm:$0xff]  ;;  %v4039_v47 = vld [vmem:[#allocation18_spill] sm:$0xff] }
 0x18a   :  { %v847_v5 = vpop.f32.mrf.mxu1  ;;  %1041 = vmatmul.f32.gmra.mxu0 %v4031_v4 }
 0x18b   :  { %v3388_v2 = vadd.f32 %v847_v5, %v783_v3  ;;  %1171 = vmatmul.f32.gmra.mxu2 %v4032_v53  ;;  %1236 = vmatmul.f32.gmra.mxu3 %v4033_v22 }
 0x18d   :  { %1106 = vmatmul.f32.gmra.mxu1 %v4034_v62 }
 0x18e   :  { %v912_v46 = vpop.f32.mrf.mxu2  ;;  %v977_v24 = vpop.f32.mrf.mxu3 }
 0x18f   :  { %v3393_v50 = vadd.f32 %v977_v24, %v912_v46  ;;  %v785_v25 = vpop.f32.mrf.mxu0 }
 0x190   :  { %v786_v16 = vadd.f32 %v785_v25, %v3250_v57  ;;  %v4038_v57 = vld [vmem:[#allocation17_spill] sm:$0xff] }
 0x192   :  { %v850_v41 = vpop.f32.mrf.mxu1  ;;  %1044 = vmatmul.f32.gmra.mxu0 %v4035_v45 }
 0x193   :  { %v3397_v59 = vadd.f32 %v850_v41, %v786_v16  ;;  %1174 = vmatmul.f32.gmra.mxu2 %v4036_v43  ;;  %1239 = vmatmul.f32.gmra.mxu3 %v3241_v54 }
 0x195   :  { %1109 = vmatmul.f32.gmra.mxu1 %v4037_v60  ;;  %v4041_v60 = vld [vmem:[#allocation20_spill] sm:$0xff] }
 0x196   :  { %v915_v0 = vpop.f32.mrf.mxu2  ;;  %v980_v37 = vpop.f32.mrf.mxu3 }
 0x197   :  { %v3402_v35 = vadd.f32 %v980_v37, %v915_v0  ;;  %v788_v29 = vpop.f32.mrf.mxu0  ;;  %v747_v0 = vadd.f32 %v3271_v44, %v4041_v60 }
 0x198   :  { %v789_v20 = vadd.f32 %v788_v29, %v3261_v8  ;;  %v4040_v8 = vld [vmem:[#allocation19_spill] sm:$0xff] }
 0x199   :  { %v744_v62 = vadd.f32 %v3259_v58, %v4040_v8 }
 0x19a   :  { %v853_v14 = vpop.f32.mrf.mxu1  ;;  %1047 = vmatmul.f32.gmra.mxu0 %v4038_v57 }
 0x19b   :  { %v3406_v30 = vadd.f32 %v853_v14, %v789_v20  ;;  %1177 = vmatmul.f32.gmra.mxu2 %v3248_v63  ;;  %1242 = vmatmul.f32.gmra.mxu3 %v3253_v1  ;;  %v3417_v1 = vadd.f32 %v3263_v10, %v744_v62  ;;  %v4042_v62 = vld [vmem:[#allocation21_spill] sm:$0xff] }
 0x19d   :  { %1112 = vmatmul.f32.gmra.mxu1 %v4039_v47  ;;  %v1311_v10 = vmul.f32 %v3417_v1, %v3417_v1 }
 0x19e   :  { %v918_v54 = vpop.f32.mrf.mxu2  ;;  %v983_v3 = vpop.f32.mrf.mxu3 }
 0x19f   :  { %v3411_v5 = vadd.f32 %v983_v3, %v918_v54  ;;  %v1003_v4 = vpop.f32.mrf.mxu0  ;;  %v3433_v3 = vadd.f32 %v3273_v9, %v747_v0 }
 0x1a0   :  { %v1004_v53 = vadd.f32 %v1003_v4, %v3269_v39 }
 0x1a1   :  { %v1313_v9 = vmul.f32 %v3433_v3, %v3433_v3 }
 0x1a2   :  { %v1068_v22 = vpop.f32.mrf.mxu1 }
 0x1a3   :  { %v1069_v46 = vadd.f32 %v1068_v22, %v1004_v53 }
 0x1a6   :  { %v1133_v24 = vpop.f32.mrf.mxu2  ;;  %v1198_v25 = vpop.f32.mrf.mxu3 }
 0x1a7   :  { %v1134_v16 = vadd.f32 %v1133_v24, %v1069_v46  ;;  %v1006_v63 = vpop.f32.mrf.mxu0  ;;  %v750_v46 = vadd.f32 %v3281_v12, %v4042_v62 }
 0x1a8   :  { %v1007_v41 = vadd.f32 %v1006_v63, %v3279_v49 }
 0x1a9   :  { %v3420_v45 = vadd.f32 %v1198_v25, %v1134_v16 }
 0x1aa   :  { %v1071_v43 = vpop.f32.mrf.mxu1 }
 0x1ab   :  { %v1247_v39 = vsel %vm1246_vm0, %v3420_v45, 0.0  ;;  %v1312_v58 = vmul.f32 %v3420_v45, %v3420_v45  ;;  %v1072_v29 = vadd.f32 %v1071_v43, %v1007_v41 }
 0x1ac   :  { %v1248_v37 = vadd.f32 %v1247_v39, %v3417_v1 }
 0x1ad   :  { %v1343_v49 = vsel %vm1246_vm0, %v1312_v58, 0.0  ;;  %v3449_v58 = vadd.f32 %v3283_v18, %v750_v46 }
 0x1ae   :  { %v1136_v20 = vpop.f32.mrf.mxu2  ;;  %1249 = vadd.xlane.f32.xlu0 %v1248_v37  ;;  %v1201_v14 = vpop.f32.mrf.mxu3  ;;  %v1344_v57 = vadd.f32 %v1343_v49, %v1311_v10 }
 0x1af   :  { %v1137_v47 = vadd.f32 %v1136_v20, %v1072_v29  ;;  %v1009_v54 = vpop.f32.mrf.mxu0  ;;  %v1315_v49 = vmul.f32 %v3449_v58, %v3449_v58 }
 0x1b0   :  { %1345 = vadd.xlane.f32.xlu1 %v1344_v57  ;;  %v1010_v44 = vadd.f32 %v1009_v54, %v3289_v17 }
 0x1b1   :  { %v3436_v4 = vadd.f32 %v1201_v14, %v1137_v47  ;;  %v4043_v14 = vld [vmem:[#allocation22_spill] sm:$0xff] }
 0x1b2   :  { %v1074_v53 = vpop.f32.mrf.mxu1 }
 0x1b3   :  { %v1251_v22 = vsel %vm1246_vm0, %v3436_v4, 0.0  ;;  %v1314_v8 = vmul.f32 %v3436_v4, %v3436_v4  ;;  %v1075_v25 = vadd.f32 %v1074_v53, %v1010_v44 }
 0x1b4   :  { %v1252_v24 = vadd.f32 %v1251_v22, %v3433_v3 }
 0x1b5   :  { %v1347_v17 = vsel %vm1246_vm0, %v1314_v8, 0.0 }
 0x1b6   :  { %v1139_v16 = vpop.f32.mrf.mxu2  ;;  %1253 = vadd.xlane.f32.xlu0 %v1252_v24  ;;  %v1204_v63 = vpop.f32.mrf.mxu3  ;;  %v1348_v41 = vadd.f32 %v1347_v17, %v1313_v9  ;;  %v4044_v17 = vld [vmem:[#allocation23_spill] sm:$0xff] }
 0x1b7   :  { %v1140_v43 = vadd.f32 %v1139_v16, %v1075_v25  ;;  %v1012_v39 = vpop.f32.mrf.mxu0  ;;  %v756_v16 = vadd.f32 %v3301_v56, %v4044_v17 }
 0x1b8   :  { %1349 = vadd.xlane.f32.xlu2 %v1348_v41  ;;  %v1013_v12 = vadd.f32 %v1012_v39, %v3299_v23  ;;  %v753_v23 = vadd.f32 %v3291_v33, %v4043_v14 }
 0x1b9   :  { %v3452_v60 = vadd.f32 %v1204_v63, %v1140_v43 }
 0x1ba   :  { %v1077_v0 = vpop.f32.mrf.mxu1  ;;  %v3468_v62 = vadd.f32 %v3293_v28, %v753_v23 }
 0x1bb   :  { %v1255_v37 = vsel %vm1246_vm0, %v3452_v60, 0.0  ;;  %v1316_v10 = vmul.f32 %v3452_v60, %v3452_v60  ;;  %v1078_v20 = vadd.f32 %v1077_v0, %v1013_v12  ;;  %v3482_v0 = vadd.f32 %v3303_v13, %v756_v16 }
 0x1bc   :  { %v1256_v29 = vadd.f32 %v1255_v37, %v3449_v58 }
 0x1bd   :  { %v1351_v18 = vsel %vm1246_vm0, %v1316_v10, 0.0  ;;  %v1317_v10 = vmul.f32 %v3468_v62, %v3468_v62 }
 0x1be   :  { %v1142_v57 = vpop.f32.mrf.mxu2  ;;  %1257 = vadd.xlane.f32.xlu1 %v1256_v29  ;;  %v1207_v47 = vpop.f32.mrf.mxu3  ;;  %v1352_v54 = vadd.f32 %v1351_v18, %v1315_v49  ;;  %v4045_v29 = vld [vmem:[#allocation24_spill] sm:$0xff] }
 0x1bf   :  { %v1143_v44 = vadd.f32 %v1142_v57, %v1078_v20  ;;  %v1015_v53 = vpop.f32.mrf.mxu0  ;;  %v759_v49 = vadd.f32 %v3311_v15, %v4045_v29 }
 0x1c0   :  { %1353 = vadd.xlane.f32.xlu0 %v1352_v54  ;;  %v1016_v22 = vadd.f32 %v1015_v53, %v3309_v51 }
 0x1c1   :  { %v3465_v8 = vadd.f32 %v1207_v47, %v1143_v44  ;;  %v3494_v54 = vadd.f32 %v3313_v27, %v759_v49  ;;  %v4047_v49 = vld [vmem:[#allocation26_spill] sm:$0xff] }
 0x1c2   :  { %v1080_v46 = vpop.f32.mrf.mxu1 }
 0x1c3   :  { %v1259_v24 = vsel %vm1246_vm0, %v3465_v8, 0.0  ;;  %v1081_v9 = vadd.f32 %v1080_v46, %v1016_v22  ;;  %v1318_v25 = vmul.f32 %v3465_v8, %v3465_v8  ;;  %v1319_v46 = vmul.f32 %v3482_v0, %v3482_v0 }
 0x1c4   :  { %v1260_v33 = vadd.f32 %v1259_v24, %v3468_v62  ;;  %v1321_v27 = vmul.f32 %v3494_v54, %v3494_v54 }
 0x1c5   :  { %v1355_v12 = vsel %vm1246_vm0, %v1318_v25, 0.0 }
 0x1c6   :  { %v1145_v63 = vpop.f32.mrf.mxu2  ;;  %1261 = vadd.xlane.f32.xlu1 %v1260_v33  ;;  %v1210_v51 = vpop.f32.mrf.mxu3  ;;  %v4046_v33 = vld [vmem:[#allocation25_spill] sm:$0xff] }
 0x1c7   :  { %v1146_v41 = vadd.f32 %v1145_v63, %v1081_v9  ;;  %v1018_v43 = vpop.f32.mrf.mxu0  ;;  %v762_v9 = vadd.f32 %v3321_v31, %v4046_v33 }
 0x1c8   :  { %v1019_v28 = vadd.f32 %v1018_v43, %v3319_v6  ;;  %v1356_v6 = vadd.f32 %v1355_v12, %v1317_v10 }
 0x1c9   :  { %v3478_v39 = vadd.f32 %v1210_v51, %v1146_v41 }
 0x1ca   :  { %v1083_v37 = vpop.f32.mrf.mxu1 }
 0x1cb   :  { %v1263_v56 = vsel %vm1246_vm0, %v3478_v39, 0.0  ;;  %v1084_v18 = vadd.f32 %v1083_v37, %v1019_v28  ;;  %v1320_v14 = vmul.f32 %v3478_v39, %v3478_v39  ;;  %v3510_v28 = vadd.f32 %v3323_v52, %v762_v9 }
 0x1cc   :  { %v1264_v20 = vadd.f32 %v1263_v56, %v3482_v0 }
 0x1cd   :  { %v1359_v15 = vsel %vm1246_vm0, %v1320_v14, 0.0 }
 0x1ce   :  { %v1148_v23 = vpop.f32.mrf.mxu2  ;;  %1265 = vadd.xlane.f32.xlu2 %v1264_v20  ;;  %1357 = vadd.xlane.f32.xlu1 %v1356_v6  ;;  %v1213_v13 = vpop.f32.mrf.mxu3  ;;  %v1360_v25 = vadd.f32 %v1359_v15, %v1319_v46  ;;  %v765_v20 = vadd.f32 %v3331_v48, %v4047_v49 }
 0x1cf   :  { %v1149_v57 = vadd.f32 %v1148_v23, %v1084_v18  ;;  %v1021_v47 = vpop.f32.mrf.mxu0 }
 0x1d0   :  { %v1022_v44 = vadd.f32 %v1021_v47, %v3329_v21  ;;  %v3529_v15 = vadd.f32 %v3333_v26, %v765_v20 }
 0x1d1   :  { %v3497_v53 = vadd.f32 %v1213_v13, %v1149_v57 }
 0x1d2   :  { %v1086_v22 = vpop.f32.mrf.mxu1  ;;  %v1325_v9 = vmul.f32 %v3529_v15, %v3529_v15 }
 0x1d3   :  { %v1322_v24 = vmul.f32 %v3497_v53, %v3497_v53  ;;  %v1087_v17 = vadd.f32 %v1086_v22, %v1022_v44  ;;  %v1267_v37 = vsel %vm1246_vm0, %v3497_v53, 0.0 }
 0x1d4   :  { %v1268_v52 = vadd.f32 %v1267_v37, %v3494_v54 }
 0x1d5   :  { %v1363_v21 = vsel %vm1246_vm0, %v1322_v24, 0.0 }
 0x1d6   :  { %v1151_v16 = vpop.f32.mrf.mxu2  ;;  %1361 = vadd.xlane.f32.xlu2 %v1360_v25  ;;  %v1216_v63 = vpop.f32.mrf.mxu3  ;;  %v1364_v51 = vadd.f32 %v1363_v21, %v1321_v27 }
 0x1d7   :  { %v1152_v41 = vadd.f32 %v1151_v16, %v1087_v17  ;;  %v1024_v43 = vpop.f32.mrf.mxu0 }
 0x1d8   :  { %1365 = vadd.xlane.f32.xlu0 %v1364_v51  ;;  %v1025_v12 = vadd.f32 %v1024_v43, %v3339_v42  ;;  %v1323_v42 = vmul.f32 %v3510_v28, %v3510_v28 }
 0x1d9   :  { %v3513_v31 = vadd.f32 %v1216_v63, %v1152_v41 }
 0x1da   :  { %v1089_v10 = vpop.f32.mrf.mxu1 }
 0x1db   :  { %v1324_v56 = vmul.f32 %v3513_v31, %v3513_v31  ;;  %v1271_v29 = vsel %vm1246_vm0, %v3513_v31, 0.0  ;;  %v1090_v6 = vadd.f32 %v1089_v10, %v1025_v12  ;;  %v1327_v10 = vmul.f32 %v3343_v38, %v3343_v38 }
 0x1dc   :  { %v1272_v57 = vadd.f32 %v1271_v29, %v3510_v28 }
 0x1dd   :  { %v1367_v18 = vsel %vm1246_vm0, %v1324_v56, 0.0 }
 0x1de   :  { %v1154_v14 = vpop.f32.mrf.mxu2  ;;  %1269 = vadd.xlane.f32.xlu2 %v1268_v52  ;;  %v1219_v23 = vpop.f32.mrf.mxu3  ;;  %v1368_v13 = vadd.f32 %v1367_v18, %v1323_v42 }
 0x1df   :  { %v1155_v47 = vadd.f32 %v1154_v14, %v1090_v6  ;;  %v1027_v44 = vpop.f32.mrf.mxu0 }
 0x1e0   :  { %1369 = vadd.xlane.f32.xlu1 %v1368_v13  ;;  %1273 = vadd.xlane.f32.xlu0 %v1272_v57  ;;  %v1028_v48 = vadd.f32 %v1027_v44, %v3348_v11 }
 0x1e1   :  { %v3532_v22 = vadd.f32 %v1219_v23, %v1155_v47  ;;  %v1329_v47 = vmul.f32 %v3352_v55, %v3352_v55 }
 0x1e2   :  { %v1092_v46 = vpop.f32.mrf.mxu1 }
 0x1e3   :  { %v1326_v24 = vmul.f32 %v3532_v22, %v3532_v22  ;;  %v1275_v33 = vsel %vm1246_vm0, %v3532_v22, 0.0  ;;  %v1093_v25 = vadd.f32 %v1092_v46, %v1028_v48 }
 0x1e4   :  { %v1276_v11 = vadd.f32 %v1275_v33, %v3529_v15 }
 0x1e5   :  { %v1371_v26 = vsel %vm1246_vm0, %v1326_v24, 0.0 }
 0x1e6   :  { %v1157_v27 = vpop.f32.mrf.mxu2  ;;  %v1222_v17 = vpop.f32.mrf.mxu3  ;;  %v1372_v21 = vadd.f32 %v1371_v26, %v1325_v9 }
 0x1e7   :  { %v1158_v16 = vadd.f32 %v1157_v27, %v1093_v25  ;;  %v1030_v63 = vpop.f32.mrf.mxu0 }
 0x1e8   :  { %1373 = vadd.xlane.f32.xlu2 %v1372_v21  ;;  %1277 = vadd.xlane.f32.xlu1 %v1276_v11  ;;  %v1031_v51 = vadd.f32 %v1030_v63, %v3357_v61 }
 0x1e9   :  { %v3543_v41 = vadd.f32 %v1222_v17, %v1158_v16  ;;  %v1331_v16 = vmul.f32 %v3361_v36, %v3361_v36 }
 0x1ea   :  { %v1095_v43 = vpop.f32.mrf.mxu1 }
 0x1eb   :  { %v1279_v12 = vsel %vm1246_vm0, %v3543_v41, 0.0  ;;  %v1328_v37 = vmul.f32 %v3543_v41, %v3543_v41  ;;  %v1096_v56 = vadd.f32 %v1095_v43, %v1031_v51 }
 0x1ec   :  { %v1280_v52 = vadd.f32 %v1279_v12, %v3343_v38 }
 0x1ed   :  { %v1375_v29 = vsel %vm1246_vm0, %v1328_v37, 0.0 }
 0x1ee   :  { %v1160_v49 = vpop.f32.mrf.mxu2  ;;  %v1225_v20 = vpop.f32.mrf.mxu3  ;;  %v1376_v61 = vadd.f32 %v1375_v29, %v1327_v10 }
 0x1ef   :  { %v1161_v42 = vadd.f32 %v1160_v49, %v1096_v56  ;;  %v1033_v6 = vpop.f32.mrf.mxu0 }
 0x1f0   :  { %1281 = vadd.xlane.f32.xlu2 %v1280_v52  ;;  %1377 = vadd.xlane.f32.xlu0 %v1376_v61  ;;  %v1034_v18 = vadd.f32 %v1033_v6, %v3366_v7 }
 0x1f1   :  { %v3554_v14 = vadd.f32 %v1225_v20, %v1161_v42  ;;  %v1333_v42 = vmul.f32 %v3370_v34, %v3370_v34 }
 0x1f2   :  { %v1098_v23 = vpop.f32.mrf.mxu1 }
 0x1f3   :  { %v1330_v13 = vmul.f32 %v3554_v14, %v3554_v14  ;;  %v1283_v57 = vsel %vm1246_vm0, %v3554_v14, 0.0  ;;  %v1099_v44 = vadd.f32 %v1098_v23, %v1034_v18 }
 0x1f4   :  { %v1284_v7 = vadd.f32 %v1283_v57, %v3352_v55 }
 0x1f5   :  { %v1379_v48 = vsel %vm1246_vm0, %v1330_v13, 0.0 }
 0x1f6   :  { %v1163_v46 = vpop.f32.mrf.mxu2  ;;  %v1228_v24 = vpop.f32.mrf.mxu3  ;;  %v1380_v33 = vadd.f32 %v1379_v48, %v1329_v47 }
 0x1f7   :  { %v1164_v9 = vadd.f32 %v1163_v46, %v1099_v44  ;;  %v1036_v25 = vpop.f32.mrf.mxu0 }
 0x1f8   :  { %1381 = vadd.xlane.f32.xlu1 %v1380_v33  ;;  %1285 = vadd.xlane.f32.xlu0 %v1284_v7  ;;  %v1037_v26 = vadd.f32 %v1036_v25, %v3375_v32 }
 0x1f9   :  { %v3565_v27 = vadd.f32 %v1228_v24, %v1164_v9  ;;  %v1335_v9 = vmul.f32 %v3379_v40, %v3379_v40 }
 0x1fa   :  { %v1101_v17 = vpop.f32.mrf.mxu1 }
 0x1fb   :  { %v1332_v21 = vmul.f32 %v3565_v27, %v3565_v27  ;;  %v1287_v11 = vsel %vm1246_vm0, %v3565_v27, 0.0  ;;  %v1102_v63 = vadd.f32 %v1101_v17, %v1037_v26 }
 0x1fc   :  { %v1288_v32 = vadd.f32 %v1287_v11, %v3361_v36 }
 0x1fd   :  { %v1383_v51 = vsel %vm1246_vm0, %v1332_v21, 0.0 }
 0x1fe   :  { %v1166_v43 = vpop.f32.mrf.mxu2  ;;  %v1231_v12 = vpop.f32.mrf.mxu3  ;;  %v1384_v37 = vadd.f32 %v1383_v51, %v1331_v16 }
 0x1ff   :  { %v1167_v10 = vadd.f32 %v1166_v43, %v1102_v63  ;;  %v1039_v56 = vpop.f32.mrf.mxu0 }
 0x200   :  { %1385 = vadd.xlane.f32.xlu2 %v1384_v37  ;;  %1289 = vadd.xlane.f32.xlu1 %v1288_v32  ;;  %v1040_v29 = vadd.f32 %v1039_v56, %v3384_v19 }
 0x201   :  { %v3576_v49 = vadd.f32 %v1231_v12, %v1167_v10  ;;  %v1337_v10 = vmul.f32 %v3388_v2, %v3388_v2 }
 0x202   :  { %v1104_v20 = vpop.f32.mrf.mxu1 }
 0x203   :  { %v1291_v52 = vsel %vm1246_vm0, %v3576_v49, 0.0  ;;  %v1334_v61 = vmul.f32 %v3576_v49, %v3576_v49  ;;  %v1105_v6 = vadd.f32 %v1104_v20, %v1040_v29 }
 0x204   :  { %v1292_v57 = vadd.f32 %v1291_v52, %v3370_v34 }
 0x205   :  { %v1387_v18 = vsel %vm1246_vm0, %v1334_v61, 0.0 }
 0x206   :  { %v1169_v23 = vpop.f32.mrf.mxu2  ;;  %v1234_v13 = vpop.f32.mrf.mxu3  ;;  %v1388_v19 = vadd.f32 %v1387_v18, %v1333_v42 }
 0x207   :  { %v1170_v47 = vadd.f32 %v1169_v23, %v1105_v6  ;;  %v1042_v44 = vpop.f32.mrf.mxu0 }
 0x208   :  { %1293 = vadd.xlane.f32.xlu2 %v1292_v57  ;;  %1389 = vadd.xlane.f32.xlu0 %v1388_v19  ;;  %v1043_v48 = vadd.f32 %v1042_v44, %v3393_v50 }
 0x209   :  { %v3587_v46 = vadd.f32 %v1234_v13, %v1170_v47  ;;  %v1339_v47 = vmul.f32 %v3397_v59, %v3397_v59 }
 0x20a   :  { %v1107_v24 = vpop.f32.mrf.mxu1 }
 0x20b   :  { %v1336_v33 = vmul.f32 %v3587_v46, %v3587_v46  ;;  %v1295_v7 = vsel %vm1246_vm0, %v3587_v46, 0.0  ;;  %v1108_v25 = vadd.f32 %v1107_v24, %v1043_v48 }
 0x20c   :  { %v1296_v50 = vadd.f32 %v1295_v7, %v3379_v40 }
 0x20d   :  { %v1391_v26 = vsel %vm1246_vm0, %v1336_v33, 0.0 }
 0x20e   :  { %v1172_v17 = vpop.f32.mrf.mxu2  ;;  %v1237_v21 = vpop.f32.mrf.mxu3  ;;  %v1392_v11 = vadd.f32 %v1391_v26, %v1335_v9 }
 0x20f   :  { %v1173_v16 = vadd.f32 %v1172_v17, %v1108_v25  ;;  %v1045_v63 = vpop.f32.mrf.mxu0  ;;  %v2039_v25 = vmov 0  }
 0x210   :  { %1393 = vadd.xlane.f32.xlu1 %v1392_v11  ;;  %1297 = vadd.xlane.f32.xlu0 %v1296_v50  ;;  %v1046_v51 = vadd.f32 %v1045_v63, %v3402_v35 }
 0x211   :  { %v3598_v43 = vadd.f32 %v1237_v21, %v1173_v16  ;;  %2004 = vset.pattern.permute.xlu2 %v2039_v25  ;;  %2005 = vset.pattern.permute.xlu1 %v2039_v25 }
 0x212   :  { %v1110_v12 = vpop.f32.mrf.mxu1  ;;  %2006 = vset.pattern.permute.xlu0 %v2039_v25 }
 0x213   :  { %v1338_v37 = vmul.f32 %v3598_v43, %v3598_v43  ;;  %v1299_v32 = vsel %vm1246_vm0, %v3598_v43, 0.0  ;;  %v1111_v56 = vadd.f32 %v1110_v12, %v1046_v51  ;;  %v1341_v12 = vmul.f32 %v3406_v30, %v3406_v30 }
 0x214   :  { %v1300_v35 = vadd.f32 %v1299_v32, %v3388_v2 }
 0x215   :  { %v1395_v29 = vsel %vm1246_vm0, %v1338_v37, 0.0 }
 0x216   :  { %v1175_v20 = vpop.f32.mrf.mxu2  ;;  %v1240_v52 = vpop.f32.mrf.mxu3  ;;  %v1396_v61 = vadd.f32 %v1395_v29, %v1337_v10 }
 0x217   :  { %v1176_v42 = vadd.f32 %v1175_v20, %v1111_v56  ;;  %v1048_v6 = vpop.f32.mrf.mxu0 }
 0x218   :  { %1397 = vadd.xlane.f32.xlu2 %v1396_v61  ;;  %1301 = vadd.xlane.f32.xlu1 %v1300_v35  ;;  %v1049_v18 = vadd.f32 %v1048_v6, %v3411_v5 }
 0x219   :  { %v3609_v23 = vadd.f32 %v1240_v52, %v1176_v42 }
 0x21a   :  { %v1113_v13 = vpop.f32.mrf.mxu1 }
 0x21b   :  { %v1303_v57 = vsel %vm1246_vm0, %v3609_v23, 0.0  ;;  %v1340_v19 = vmul.f32 %v3609_v23, %v3609_v23  ;;  %v1114_v44 = vadd.f32 %v1113_v13, %v1049_v18 }
 0x21c   :  { %v1304_v7 = vadd.f32 %v1303_v57, %v3397_v59 }
 0x21d   :  { %v1399_v48 = vsel %vm1246_vm0, %v1340_v19, 0.0 }
 0x21e   :  { %v1178_v24 = vpop.f32.mrf.mxu2  ;;  %v1243_v33 = vpop.f32.mrf.mxu3  ;;  %v1400_v5 = vadd.f32 %v1399_v48, %v1339_v47 }
 0x21f   :  { %v1179_v9 = vadd.f32 %v1178_v24, %v1114_v44 }
 0x220   :  { %1305 = vadd.xlane.f32.xlu2 %v1304_v7  ;;  %1401 = vadd.xlane.f32.xlu0 %v1400_v5 }
 0x221   :  { %v3619_v26 = vadd.f32 %v1243_v33, %v1179_v9  ;;  %v1250_v17 = vpop.xlane.xlu0 %1249 }
 0x222   :  { %v1407_v21 = vmul.f32 0.0051020407, %v1250_v17 }
 0x223   :  { %v1346_v11 = vpop.xlane.xlu1 %1345  ;;  %v1342_v50 = vmul.f32 %v3619_v26, %v3619_v26  ;;  %v1307_v16 = vsel %vm1246_vm0, %v3619_v26, 0.0 }
 0x224   :  { %v1439_v63 = vmul.f32 %v1407_v21, %v1407_v21  ;;  %v1423_v51 = vmul.f32 0.0051020407, %v1346_v11  ;;  %v1308_v56 = vadd.f32 %v1307_v16, %v3406_v30 }
 0x225   :  { %v1403_v37 = vsel %vm1246_vm0, %v1342_v50, 0.0 }
 0x226   :  { %v1455_v32 = vsub.f32 %v1423_v51, %v1439_v63  ;;  %v1404_v10 = vadd.f32 %v1403_v37, %v1341_v12  ;;  %v1487_v12 = vld [vmem:[%s3957_s3] sm:$0xff] }
 0x228   :  { %v1471_v29 = vmax.f32 %v1455_v32, 0.0  ;;  %1405 = vadd.xlane.f32.xlu1 %v1404_v10  ;;  %1309 = vadd.xlane.f32.xlu0 %v1308_v56 }
 0x229   :  { %v1254_v20 = vpop.xlane.xlu0 %1253 }
 0x22a   :  { %v1503_v52 = vadd.f32 0.001, %v1471_v29  ;;  %v3629_v61 = vmul.f32 0.0051020407, %v1254_v20 }
 0x22b   :  { %v1350_v35 = vpop.xlane.xlu2 %1349 }
 0x22c   :  { %2007 = vrsqrt.f32 %v1503_v52  ;;  %v1440_v42 = vmul.f32 %v3629_v61, %v3629_v61  ;;  %v1424_v6 = vmul.f32 0.0051020407, %v1350_v35  ;;  %vm1525_vm2 = vweird.f32 %v1503_v52  ;;  %v1695_v35 = vld [vmem:[%s3958_s4] sm:$0xff] }
 0x22e   :  { %v1456_v18 = vsub.f32 %v1424_v6, %v1440_v42 }
 0x230   :  { %v1472_v13 = vmax.f32 %v1456_v18, 0.0 }
 0x231   :  { %v1258_v57 = vpop.xlane.xlu1 %1257 }
 0x232   :  { %v2008_v19 = vpop.eup %2007  ;;  %v1504_v47 = vadd.f32 0.001, %v1472_v13  ;;  %v3633_v44 = vmul.f32 0.0051020407, %v1258_v57 }
 0x233   :  { %v1520_v48 = vmul.f32 %v2008_v19, %v1503_v52  ;;  %v1354_v24 = vpop.xlane.xlu0 %1353  ;;  %vm1526_vm1 = vweird.f32 %v2008_v19 }
 0x234   :  { %2009 = vrsqrt.f32 %v1504_v47  ;;  %v1441_v33 = vmul.f32 %v3633_v44, %v3633_v44  ;;  %v1425_v7 = vmul.f32 0.0051020407, %v1354_v24  ;;  %vm1527_vm3 = vmor %vm1525_vm2, %vm1526_vm1  ;;  %vm1535_vm5 = vweird.f32 %v1504_v47 }
 0x235   :  { %v1521_v5 = vmul.f32 %v2008_v19, %v1520_v48 }
 0x236   :  { %v1457_v9 = vsub.f32 %v1425_v7, %v1441_v33  ;;  %v1488_v33 = vld [vmem:[%s3957_s3 + $0x8] sm:$0xff] }
 0x237   :  { %v1522_v25 = vmul.f32 0.5, %v1521_v5 }
 0x238   :  { %v1473_v17 = vmax.f32 %v1457_v9, 0.0 }
 0x239   :  { %v1523_v11 = vsub.f32 1.5, %v1522_v25  ;;  %v1262_v50 = vpop.xlane.xlu1 %1261 }
 0x23a   :  { %v2010_v16 = vpop.eup %2009  ;;  %v1505_v63 = vadd.f32 0.001, %v1473_v17  ;;  %v3640_v56 = vmul.f32 0.0051020407, %v1262_v50 }
 0x23b   :  { %v1530_v51 = vmul.f32 %v2010_v16, %v1504_v47  ;;  %v1524_v37 = vmul.f32 %v2008_v19, %v1523_v11  ;;  %vm1536_vm4 = vweird.f32 %v2010_v16 }
 0x23c   :  { %2011 = vrsqrt.f32 %v1505_v63  ;;  %v1442_v57 = vmul.f32 %v3640_v56, %v3640_v56  ;;  %vm1537_vm6 = vmor %vm1535_vm5, %vm1536_vm4  ;;  %vm1545_vm8 = vweird.f32 %v1505_v63 }
 0x23d   :  { %v1531_v32 = vmul.f32 %v2010_v16, %v1530_v51  ;;  %v1528_v10 = vsel %vm1527_vm3, %v2008_v19, %v1524_v37 }
 0x23e   :  { %v1679_v29 = vmul.f32 %v1528_v10, %v1487_v12 }
 0x23f   :  { %v1532_v20 = vmul.f32 0.5, %v1531_v32 }
 0x240   :  { %1745 = vperm.xlu2 %2004, %v1679_v29   ;;  %v1711_v52 = vmul.f32 %v1679_v29, %v1407_v21 }
 0x241   :  { %v1533_v42 = vsub.f32 1.5, %v1532_v20  ;;  %v1266_v6 = vpop.xlane.xlu2 %1265  ;;  %v1358_v18 = vpop.xlane.xlu1 %1357 }
 0x242   :  { %v2012_v13 = vpop.eup %2011  ;;  %v1426_v48 = vmul.f32 0.0051020407, %v1358_v18  ;;  %v1727_v19 = vsub.f32 %v1695_v35, %v1711_v52  ;;  %v3650_v25 = vmul.f32 0.0051020407, %v1266_v6  ;;  %v1696_v35 = vld [vmem:[%s3958_s4 + $0x8] sm:$0xff] }
 0x243   :  { %v1540_v24 = vmul.f32 %v2012_v13, %v1505_v63  ;;  %v1534_v7 = vmul.f32 %v2010_v16, %v1533_v42  ;;  %vm1546_vm7 = vweird.f32 %v2012_v13 }
 0x244   :  { %v1458_v5 = vsub.f32 %v1426_v48, %v1442_v57  ;;  %1857 = vperm.xlu1 %2005, %v1727_v19   ;;  %v1443_v37 = vmul.f32 %v3650_v25, %v3650_v25  ;;  %vm1547_vm9 = vmor %vm1545_vm8, %vm1546_vm7 }
 0x245   :  { %v1541_v21 = vmul.f32 %v2012_v13, %v1540_v24  ;;  %v1538_v9 = vsel %vm1537_vm6, %v2010_v16, %v1534_v7  ;;  %v1489_v16 = vld [vmem:[%s3957_s3 + $0x10] sm:$0xff] }
 0x246   :  { %v1474_v17 = vmax.f32 %v1458_v5, 0.0  ;;  %v1680_v11 = vmul.f32 %v1538_v9, %v1488_v33 }
 0x247   :  { %v1542_v50 = vmul.f32 0.5, %v1541_v21 }
 0x248   :  { %v1506_v51 = vadd.f32 0.001, %v1474_v17  ;;  %1750 = vperm.xlu0 %2006, %v1680_v11   ;;  %v1712_v10 = vmul.f32 %v1680_v11, %v3629_v61  ;;  %v1697_v61 = vld [vmem:[%s3958_s4 + $0x10] sm:$0xff] }
 0x249   :  { %v1543_v12 = vsub.f32 1.5, %v1542_v50  ;;  %v1362_v47 = vpop.xlane.xlu2 %1361 }
 0x24a   :  { %2013 = vrsqrt.f32 %v1506_v51  ;;  %v1427_v32 = vmul.f32 0.0051020407, %v1362_v47  ;;  %v1728_v57 = vsub.f32 %v1696_v35, %v1712_v10  ;;  %vm1555_vm11 = vweird.f32 %v1506_v51 }
 0x24b   :  { %v1366_v29 = vpop.xlane.xlu0 %1365  ;;  %v1544_v20 = vmul.f32 %v2012_v13, %v1543_v12 }
 0x24c   :  { %v1459_v52 = vsub.f32 %v1427_v32, %v1443_v37  ;;  %v1428_v17 = vmul.f32 0.0051020407, %v1366_v29 }
 0x24d   :  { %v1548_v42 = vsel %vm1547_vm9, %v2012_v13, %v1544_v20 }
 0x24e   :  { %v1475_v6 = vmax.f32 %v1459_v52, 0.0  ;;  %v1681_v18 = vmul.f32 %v1548_v42, %v1489_v16 }
 0x250   :  { %v2014_v63 = vpop.eup %2013  ;;  %v1507_v48 = vadd.f32 0.001, %v1475_v6  ;;  %1755 = vperm.xlu1 %2005, %v1681_v18   ;;  %1862 = vperm.xlu0 %2006, %v1728_v57   ;;  %v1713_v19 = vmul.f32 %v1681_v18, %v3633_v44  ;;  %v1490_v6 = vld [vmem:[%s3957_s3 + $0x18] sm:$0xff] }
 0x251   :  { %v1550_v24 = vmul.f32 %v2014_v63, %v1506_v51  ;;  %v1270_v33 = vpop.xlane.xlu2 %1269  ;;  %vm1556_vm10 = vweird.f32 %v2014_v63  ;;  %v1698_v51 = vld [vmem:[%s3958_s4 + $0x18] sm:$0xff] }
 0x252   :  { %2015 = vrsqrt.f32 %v1507_v48  ;;  %v3665_v7 = vmul.f32 0.0051020407, %v1270_v33  ;;  %v1729_v5 = vsub.f32 %v1697_v61, %v1713_v19  ;;  %vm1557_vm12 = vmor %vm1555_vm11, %vm1556_vm10  ;;  %vm1565_vm14 = vweird.f32 %v1507_v48 }
 0x253   :  { %v1551_v13 = vmul.f32 %v2014_v63, %v1550_v24  ;;  %v1370_v21 = vpop.xlane.xlu1 %1369  ;;  %v1274_v9 = vpop.xlane.xlu0 %1273 }
 0x254   :  { %v1444_v11 = vmul.f32 %v3665_v7, %v3665_v7  ;;  %v3669_v50 = vmul.f32 0.0051020407, %v1274_v9  ;;  %1867 = vperm.xlu2 %2004, %v1729_v5   ;;  %v1429_v37 = vmul.f32 0.0051020407, %v1370_v21 }
 0x255   :  { %v1552_v12 = vmul.f32 0.5, %v1551_v13 }
 0x256   :  { %v1460_v47 = vsub.f32 %v1428_v17, %v1444_v11  ;;  %v1445_v44 = vmul.f32 %v3669_v50, %v3669_v50 }
 0x257   :  { %v1553_v32 = vsub.f32 1.5, %v1552_v12 }
 0x258   :  { %v2016_v10 = vpop.eup %2015  ;;  %v1476_v16 = vmax.f32 %v1460_v47, 0.0  ;;  %v1461_v20 = vsub.f32 %v1429_v37, %v1445_v44  ;;  %v1491_v47 = vld [vmem:[%s3957_s3 + $0x20] sm:$0xff] }
 0x259   :  { %v1560_v35 = vmul.f32 %v2016_v10, %v1507_v48  ;;  %v1554_v29 = vmul.f32 %v2014_v63, %v1553_v32  ;;  %vm1566_vm13 = vweird.f32 %v2016_v10 }
 0x25a   :  { %v1508_v52 = vadd.f32 0.001, %v1476_v16  ;;  %v1477_v42 = vmax.f32 %v1461_v20, 0.0  ;;  %vm1567_vm15 = vmor %vm1565_vm14, %vm1566_vm13 }
 0x25b   :  { %v1561_v18 = vmul.f32 %v2016_v10, %v1560_v35  ;;  %v1374_v57 = vpop.xlane.xlu2 %1373  ;;  %v1278_v61 = vpop.xlane.xlu1 %1277  ;;  %v1558_v19 = vsel %vm1557_vm12, %v2014_v63, %v1554_v29 }
 0x25c   :  { %2017 = vrsqrt.f32 %v1508_v52  ;;  %v1509_v24 = vadd.f32 0.001, %v1477_v42  ;;  %v3676_v5 = vmul.f32 0.0051020407, %v1278_v61  ;;  %v1682_v13 = vmul.f32 %v1558_v19, %v1490_v6  ;;  %v1699_v61 = vld [vmem:[%s3958_s4 + $0x20] sm:$0xff] }
 0x25d   :  { %v1562_v33 = vmul.f32 0.5, %v1561_v18  ;;  %v1430_v9 = vmul.f32 0.0051020407, %v1374_v57  ;;  %vm1575_vm2 = vweird.f32 %v1508_v52 }
 0x25e   :  { %2019 = vrsqrt.f32 %v1509_v24  ;;  %v1446_v17 = vmul.f32 %v3676_v5, %v3676_v5  ;;  %1760 = vperm.xlu2 %2004, %v1682_v13   ;;  %v1714_v63 = vmul.f32 %v1682_v13, %v3640_v56  ;;  %vm1585_vm5 = vweird.f32 %v1509_v24 }
 0x25f   :  { %v1563_v21 = vsub.f32 1.5, %v1562_v33 }
 0x260   :  { %v1462_v11 = vsub.f32 %v1430_v9, %v1446_v17  ;;  %v1730_v12 = vsub.f32 %v1698_v51, %v1714_v63 }
 0x261   :  { %v1564_v37 = vmul.f32 %v2016_v10, %v1563_v21 }
 0x262   :  { %v2018_v44 = vpop.eup %2017  ;;  %v1478_v16 = vmax.f32 %v1462_v11, 0.0  ;;  %1872 = vperm.xlu1 %2005, %v1730_v12   ;;  %v1492_v12 = vld [vmem:[%s3957_s3 + $0x28] sm:$0xff] }
 0x263   :  { %v1570_v32 = vmul.f32 %v2018_v44, %v1508_v52  ;;  %v1282_v20 = vpop.xlane.xlu2 %1281  ;;  %v1378_v35 = vpop.xlane.xlu0 %1377  ;;  %v1568_v29 = vsel %vm1567_vm15, %v2016_v10, %v1564_v37  ;;  %vm1576_vm1 = vweird.f32 %v2018_v44 }
 0x264   :  { %v2020_v42 = vpop.eup %2019  ;;  %v3687_v6 = vmul.f32 0.0051020407, %v1282_v20  ;;  %v1683_v56 = vmul.f32 %v1568_v29, %v1491_v47  ;;  %v3689_v57 = vadd.f32 0.001, %v1478_v16  ;;  %v1431_v33 = vmul.f32 0.0051020407, %v1378_v35  ;;  %vm1577_vm4 = vmor %vm1575_vm2, %vm1576_vm1 }
 0x265   :  { %v1571_v48 = vmul.f32 %v2018_v44, %v1570_v32  ;;  %v1580_v18 = vmul.f32 %v2020_v42, %v1509_v24  ;;  %vm1586_vm3 = vweird.f32 %v2020_v42 }
 0x266   :  { %v1447_v19 = vmul.f32 %v3687_v6, %v3687_v6  ;;  %v1715_v13 = vmul.f32 %v1683_v56, %v3650_v25  ;;  %2021 = vrsqrt.f32 %v3689_v57  ;;  %1765 = vperm.xlu2 %2004, %v1683_v56   ;;  %v1493_v56 = vld [vmem:[%s3957_s3 + $0x30] sm:$0xff]  ;;  %vm1587_vm6 = vmor %vm1585_vm5, %vm1586_vm3  ;;  %vm1595_vm8 = vweird.f32 %v3689_v57 }
 0x267   :  { %v1572_v51 = vmul.f32 0.5, %v1571_v48  ;;  %v1581_v10 = vmul.f32 %v2020_v42, %v1580_v18 }
 0x268   :  { %v1463_v21 = vsub.f32 %v1431_v33, %v1447_v19  ;;  %v1731_v9 = vsub.f32 %v1699_v61, %v1715_v13 }
 0x269   :  { %v1573_v17 = vsub.f32 1.5, %v1572_v51  ;;  %v1582_v63 = vmul.f32 0.5, %v1581_v10 }
 0x26a   :  { %v1479_v11 = vmax.f32 %v1463_v21, 0.0  ;;  %1877 = vperm.xlu0 %2006, %v1731_v9  }
 0x26b   :  { %v1574_v47 = vmul.f32 %v2018_v44, %v1573_v17  ;;  %v1583_v37 = vsub.f32 1.5, %v1582_v63  ;;  %v1382_v25 = vpop.xlane.xlu1 %1381  ;;  %v1286_v32 = vpop.xlane.xlu0 %1285 }
 0x26c   :  { %v3701_v16 = vadd.f32 0.001, %v1479_v11  ;;  %v3703_v20 = vmul.f32 0.0051020407, %v1286_v32  ;;  %v2022_v35 = vpop.eup %2021  ;;  %v1432_v19 = vmul.f32 0.0051020407, %v1382_v25 }
 0x26d   :  { %v1578_v29 = vsel %vm1577_vm4, %v2018_v44, %v1574_v47  ;;  %v1584_v48 = vmul.f32 %v2020_v42, %v1583_v37  ;;  %v1590_v52 = vmul.f32 %v2022_v35, %v3689_v57  ;;  %v1700_v44 = vld [vmem:[%s3958_s4 + $0x28] sm:$0xff]  ;;  %vm1596_vm7 = vweird.f32 %v2022_v35  ;;  %v1494_v32 = vld [vmem:[%s3957_s3 + $0x38] sm:$0xff] }
 0x26e   :  { %v1684_v18 = vmul.f32 %v1578_v29, %v1492_v12  ;;  %2023 = vrsqrt.f32 %v3701_v16  ;;  %v1448_v33 = vmul.f32 %v3703_v20, %v3703_v20  ;;  %v1701_v12 = vld [vmem:[%s3958_s4 + $0x30] sm:$0xff]  ;;  %vm1597_vm9 = vmor %vm1595_vm8, %vm1596_vm7  ;;  %vm1605_vm11 = vweird.f32 %v3701_v16 }
 0x26f   :  { %v1588_v61 = vsel %vm1587_vm6, %v2020_v42, %v1584_v48  ;;  %v1591_v10 = vmul.f32 %v2022_v35, %v1590_v52 }
 0x270   :  { %v1716_v13 = vmul.f32 %v1684_v18, %v3665_v7  ;;  %v1685_v51 = vmul.f32 %v1588_v61, %v1493_v56  ;;  %1770 = vperm.xlu1 %2005, %v1684_v18   ;;  %v1464_v24 = vsub.f32 %v1432_v19, %v1448_v33 }
 0x271   :  { %v1592_v9 = vmul.f32 0.5, %v1591_v10 }
 0x272   :  { %v1717_v21 = vmul.f32 %v1685_v51, %v3669_v50  ;;  %v1732_v17 = vsub.f32 %v1700_v44, %v1716_v13  ;;  %v1480_v63 = vmax.f32 %v1464_v24, 0.0  ;;  %v1702_v13 = vld [vmem:[%s3958_s4 + $0x38] sm:$0xff] }
 0x273   :  { %v1386_v42 = vpop.xlane.xlu2 %1385  ;;  %v1290_v11 = vpop.xlane.xlu1 %1289  ;;  %v1593_v37 = vsub.f32 1.5, %v1592_v9 }
 0x274   :  { %v2024_v47 = vpop.eup %2023  ;;  %v3720_v25 = vmul.f32 0.0051020407, %v1290_v11  ;;  %1882 = vperm.xlu2 %2004, %v1732_v17   ;;  %v1512_v50 = vadd.f32 0.001, %v1480_v63  ;;  %v1433_v56 = vmul.f32 0.0051020407, %v1386_v42  ;;  %v1733_v18 = vsub.f32 %v1701_v12, %v1717_v21 }
 0x275   :  { %v1600_v7 = vmul.f32 %v2024_v47, %v3701_v16  ;;  %v1594_v29 = vmul.f32 %v2022_v35, %v1593_v37  ;;  %vm1606_vm10 = vweird.f32 %v2024_v47  ;;  %v1495_v12 = vld [vmem:[%s3957_s3 + $0x40] sm:$0xff] }
 0x276   :  { %v1449_v48 = vmul.f32 %v3720_v25, %v3720_v25  ;;  %2025 = vrsqrt.f32 %v1512_v50  ;;  %vm1607_vm12 = vmor %vm1605_vm11, %vm1606_vm10  ;;  %v1703_v16 = vld [vmem:[%s3958_s4 + $0x40] sm:$0xff]  ;;  %vm1615_vm14 = vweird.f32 %v1512_v50 }
 0x277   :  { %v1601_v52 = vmul.f32 %v2024_v47, %v1600_v7  ;;  %v1598_v61 = vsel %vm1597_vm9, %v2022_v35, %v1594_v29 }
 0x278   :  { %v1465_v19 = vsub.f32 %v1433_v56, %v1449_v48  ;;  %1887 = vperm.xlu1 %2005, %v1733_v18   ;;  %v1686_v57 = vmul.f32 %v1598_v61, %v1494_v32 }
 0x279   :  { %v1602_v33 = vmul.f32 0.5, %v1601_v52 }
 0x27a   :  { %v1481_v44 = vmax.f32 %v1465_v19, 0.0  ;;  %v1718_v10 = vmul.f32 %v1686_v57, %v3676_v5 }
 0x27b   :  { %v1603_v24 = vsub.f32 1.5, %v1602_v33  ;;  %v1294_v9 = vpop.xlane.xlu2 %1293  ;;  %v1390_v17 = vpop.xlane.xlu0 %1389 }
 0x27c   :  { %v1513_v21 = vadd.f32 0.001, %v1481_v44  ;;  %v3733_v63 = vmul.f32 0.0051020407, %v1294_v9  ;;  %1775 = vperm.xlu2 %2004, %v1685_v51   ;;  %v2026_v35 = vpop.eup %2025  ;;  %v1734_v11 = vsub.f32 %v1702_v13, %v1718_v10  ;;  %v1434_v7 = vmul.f32 0.0051020407, %v1390_v17 }
 0x27d   :  { %v1604_v42 = vmul.f32 %v2024_v47, %v1603_v24  ;;  %v1610_v37 = vmul.f32 %v2026_v35, %v1512_v50  ;;  %vm1616_vm13 = vweird.f32 %v2026_v35  ;;  %v1496_v24 = vld [vmem:[%s3957_s3 + $0x48] sm:$0xff] }
 0x27e   :  { %2027 = vrsqrt.f32 %v1513_v21  ;;  %v1450_v5 = vmul.f32 %v3733_v63, %v3733_v63  ;;  %1892 = vperm.xlu0 %2006, %v1734_v11   ;;  %vm1617_vm15 = vmor %vm1615_vm14, %vm1616_vm13  ;;  %vm1625_vm2 = vweird.f32 %v1513_v21 }
 0x27f   :  { %v1608_v32 = vsel %vm1607_vm12, %v2024_v47, %v1604_v42  ;;  %v1611_v29 = vmul.f32 %v2026_v35, %v1610_v37 }
 0x280   :  { %1780 = vperm.xlu1 %2005, %v1686_v57   ;;  %v1687_v51 = vmul.f32 %v1608_v32, %v1495_v12  ;;  %v1466_v56 = vsub.f32 %v1434_v7, %v1450_v5  ;;  %v1704_v32 = vld [vmem:[%s3958_s4 + $0x48] sm:$0xff] }
 0x281   :  { %v1612_v48 = vmul.f32 0.5, %v1611_v29 }
 0x282   :  { %v1719_v18 = vmul.f32 %v1687_v51, %v3687_v6  ;;  %v1482_v52 = vmax.f32 %v1466_v56, 0.0 }
 0x283   :  { %v1394_v61 = vpop.xlane.xlu1 %1393  ;;  %v1298_v19 = vpop.xlane.xlu0 %1297  ;;  %v1613_v44 = vsub.f32 1.5, %v1612_v48 }
 0x284   :  { %v2028_v33 = vpop.eup %2027  ;;  %v3745_v13 = vmul.f32 0.0051020407, %v1298_v19  ;;  %v1735_v47 = vsub.f32 %v1703_v16, %v1719_v18  ;;  %v1514_v57 = vadd.f32 0.001, %v1482_v52  ;;  %v1435_v17 = vmul.f32 0.0051020407, %v1394_v61 }
 0x285   :  { %v1620_v10 = vmul.f32 %v2028_v33, %v1513_v21  ;;  %v1614_v9 = vmul.f32 %v2026_v35, %v1613_v44  ;;  %vm1626_vm1 = vweird.f32 %v2028_v33 }
 0x286   :  { %v1451_v6 = vmul.f32 %v3745_v13, %v3745_v13  ;;  %1897 = vperm.xlu2 %2004, %v1735_v47   ;;  %2029 = vrsqrt.f32 %v1514_v57  ;;  %1785 = vperm.xlu0 %2006, %v1687_v51   ;;  %vm1627_vm3 = vmor %vm1625_vm2, %vm1626_vm1  ;;  %vm1635_vm5 = vweird.f32 %v1514_v57 }
 0x287   :  { %v1621_v42 = vmul.f32 %v2028_v33, %v1620_v10  ;;  %v1618_v11 = vsel %vm1617_vm15, %v2026_v35, %v1614_v9  ;;  %v1497_v35 = vld [vmem:[%s3957_s3 + $0x50] sm:$0xff] }
 0x288   :  { %v1467_v12 = vsub.f32 %v1435_v17, %v1451_v6  ;;  %v1688_v37 = vmul.f32 %v1618_v11, %v1496_v24  ;;  %v1705_v17 = vld [vmem:[%s3958_s4 + $0x50] sm:$0xff] }
 0x289   :  { %v1622_v5 = vmul.f32 0.5, %v1621_v42 }
 0x28a   :  { %v1483_v7 = vmax.f32 %v1467_v12, 0.0  ;;  %v1720_v50 = vmul.f32 %v1688_v37, %v3703_v20 }
 0x28b   :  { %v1623_v29 = vsub.f32 1.5, %v1622_v5  ;;  %v1398_v56 = vpop.xlane.xlu2 %1397  ;;  %v1302_v16 = vpop.xlane.xlu1 %1301 }
 0x28c   :  { %v1515_v48 = vadd.f32 0.001, %v1483_v7  ;;  %v3756_v18 = vmul.f32 0.0051020407, %v1302_v16  ;;  %v2030_v52 = vpop.eup %2029  ;;  %v1736_v61 = vsub.f32 %v1704_v32, %v1720_v50  ;;  %v1436_v44 = vmul.f32 0.0051020407, %v1398_v56 }
 0x28d   :  { %v1624_v51 = vmul.f32 %v2028_v33, %v1623_v29  ;;  %v1630_v19 = vmul.f32 %v2030_v52, %v1514_v57  ;;  %vm1636_vm4 = vweird.f32 %v2030_v52  ;;  %v1706_v57 = vld [vmem:[%s3958_s4 + $0x58] sm:$0xff] }
 0x28e   :  { %2031 = vrsqrt.f32 %v1515_v48  ;;  %1790 = vperm.xlu2 %2004, %v1688_v37   ;;  %v1452_v47 = vmul.f32 %v3756_v18, %v3756_v18  ;;  %1902 = vperm.xlu1 %2005, %v1736_v61   ;;  %vm1637_vm6 = vmor %vm1635_vm5, %vm1636_vm4  ;;  %vm1645_vm8 = vweird.f32 %v1515_v48 }
 0x28f   :  { %v1628_v20 = vsel %vm1627_vm3, %v2028_v33, %v1624_v51  ;;  %v1631_v24 = vmul.f32 %v2030_v52, %v1630_v19 }
 0x290   :  { %v1689_v10 = vmul.f32 %v1628_v20, %v1497_v35  ;;  %v1468_v9 = vsub.f32 %v1436_v44, %v1452_v47 }
 0x291   :  { %v1632_v6 = vmul.f32 0.5, %v1631_v24 }
 0x292   :  { %v1721_v21 = vmul.f32 %v1689_v10, %v3720_v25  ;;  %v1484_v42 = vmax.f32 %v1468_v9, 0.0  ;;  %v1498_v25 = vld [vmem:[%s3957_s3 + $0x58] sm:$0xff] }
 0x293   :  { %v1306_v11 = vpop.xlane.xlu2 %1305  ;;  %v1402_v12 = vpop.xlane.xlu0 %1401  ;;  %v1633_v33 = vsub.f32 1.5, %v1632_v6 }
 0x294   :  { %v2032_v37 = vpop.eup %2031  ;;  %v3767_v5 = vmul.f32 0.0051020407, %v1306_v11  ;;  %v1737_v7 = vsub.f32 %v1705_v17, %v1721_v21  ;;  %v1516_v50 = vadd.f32 0.001, %v1484_v42  ;;  %v1437_v16 = vmul.f32 0.0051020407, %v1402_v12 }
 0x295   :  { %v1640_v32 = vmul.f32 %v2032_v37, %v1515_v48  ;;  %v1634_v29 = vmul.f32 %v2030_v52, %v1633_v33  ;;  %vm1646_vm7 = vweird.f32 %v2032_v37  ;;  %v1707_v48 = vld [vmem:[%s3958_s4 + $0x60] sm:$0xff] }
 0x296   :  { %v1453_v56 = vmul.f32 %v3767_v5, %v3767_v5  ;;  %1907 = vperm.xlu0 %2006, %v1737_v7   ;;  %2033 = vrsqrt.f32 %v1516_v50  ;;  %1795 = vperm.xlu1 %2005, %v1689_v10   ;;  %v1499_v10 = vld [vmem:[%s3957_s3 + $0x60] sm:$0xff]  ;;  %vm1647_vm9 = vmor %vm1645_vm8, %vm1646_vm7  ;;  %vm1655_vm11 = vweird.f32 %v1516_v50 }
 0x297   :  { %v1641_v35 = vmul.f32 %v2032_v37, %v1640_v32  ;;  %v1638_v61 = vsel %vm1637_vm6, %v2030_v52, %v1634_v29 }
 0x298   :  { %v1469_v51 = vsub.f32 %v1437_v16, %v1453_v56  ;;  %v1690_v20 = vmul.f32 %v1638_v61, %v1498_v25 }
 0x299   :  { %v1642_v19 = vmul.f32 0.5, %v1641_v35 }
 0x29a   :  { %v1485_v44 = vmax.f32 %v1469_v51, 0.0  ;;  %v1722_v24 = vmul.f32 %v1690_v20, %v3733_v63 }
 0x29b   :  { %v1643_v47 = vsub.f32 1.5, %v1642_v19  ;;  %v1406_v17 = vpop.xlane.xlu1 %1405  ;;  %v1310_v21 = vpop.xlane.xlu0 %1309 }
 0x29c   :  { %v1517_v9 = vadd.f32 0.001, %v1485_v44  ;;  %v2034_v6 = vpop.eup %2033  ;;  %v3781_v42 = vmul.f32 0.0051020407, %v1310_v21  ;;  %v1738_v11 = vsub.f32 %v1706_v57, %v1722_v24  ;;  %v1438_v7 = vmul.f32 0.0051020407, %v1406_v17 }
 0x29d   :  { %v1644_v52 = vmul.f32 %v2032_v37, %v1643_v47  ;;  %v1650_v12 = vmul.f32 %v2034_v6, %v1516_v50  ;;  %vm1656_vm10 = vweird.f32 %v2034_v6  ;;  %v1500_v47 = vld [vmem:[%s3957_s3 + $0x68] sm:$0xff] }
 0x29e   :  { %2035 = vrsqrt.f32 %v1517_v9  ;;  %1800 = vperm.xlu0 %2006, %v1690_v20   ;;  %v1454_v63 = vmul.f32 %v3781_v42, %v3781_v42  ;;  %1912 = vperm.xlu2 %2004, %v1738_v11   ;;  %vm1657_vm12 = vmor %vm1655_vm11, %vm1656_vm10  ;;  %vm1665_vm14 = vweird.f32 %v1517_v9 }
 0x29f   :  { %v1648_v33 = vsel %vm1647_vm9, %v2032_v37, %v1644_v52  ;;  %v1651_v29 = vmul.f32 %v2034_v6, %v1650_v12  ;;  %v1501_v52 = vld [vmem:[%s3957_s3 + $0x70] sm:$0xff] }
 0x2a0   :  { %v1691_v32 = vmul.f32 %v1648_v33, %v1499_v10  ;;  %v1470_v56 = vsub.f32 %v1438_v7, %v1454_v63  ;;  %v1746_v63 = vpop.permute.xlu2 %1745 }
 0x2a1   :  { %v1652_v25 = vmul.f32 0.5, %v1651_v29 }
 0x2a2   :  { %v1723_v16 = vmul.f32 %v1691_v32, %v3745_v13  ;;  %v1486_v35 = vmax.f32 %v1470_v56, 0.0  ;;  %v1824_v56 = vmul.f32 %v1746_v63, %v3420_v45  ;;  %v1710_v45 = vld [vmem:[%s3958_s4 + $0x78] sm:$0xff] }
 0x2a3   :  { %v1653_v61 = vsub.f32 1.5, %v1652_v25 }
 0x2a4   :  { %v2036_v51 = vpop.eup %2035  ;;  %v1739_v19 = vsub.f32 %v1707_v48, %v1723_v16  ;;  %v1518_v20 = vadd.f32 0.001, %v1486_v35  ;;  %v1708_v48 = vld [vmem:[%s3958_s4 + $0x68] sm:$0xff]  ;;  %v1502_v16 = vld [vmem:[%s3957_s3 + $0x78] sm:$0xff] }
 0x2a5   :  { %v1660_v37 = vmul.f32 %v2036_v51, %v1517_v9  ;;  %v1654_v44 = vmul.f32 %v2034_v6, %v1653_v61  ;;  %vm1666_vm13 = vweird.f32 %v2036_v51  ;;  %v1823_v9 = vmul.f32 %v1746_v63, %v3417_v1 }
 0x2a6   :  { %1917 = vperm.xlu1 %2005, %v1739_v19   ;;  %2037 = vrsqrt.f32 %v1518_v20  ;;  %1805 = vperm.xlu2 %2004, %v1691_v32   ;;  %vm1667_vm15 = vmor %vm1665_vm14, %vm1666_vm13  ;;  %vm1675_vm2 = vweird.f32 %v1518_v20 }
 0x2a7   :  { %v1661_v57 = vmul.f32 %v2036_v51, %v1660_v37  ;;  %v1658_v13 = vsel %vm1657_vm12, %v2034_v6, %v1654_v44 }
 0x2a8   :  { %v1692_v21 = vmul.f32 %v1658_v13, %v1500_v47  ;;  %v1709_v47 = vld [vmem:[%s3958_s4 + $0x70] sm:$0xff] }
 0x2a9   :  { %v1662_v24 = vmul.f32 0.5, %v1661_v57 }
 0x2aa   :  { %v1724_v6 = vmul.f32 %v1692_v21, %v3756_v18 }
 0x2ab   :  { %v1663_v17 = vsub.f32 1.5, %v1662_v24 }
 0x2ac   :  { %v2038_v10 = vpop.eup %2037  ;;  %v1740_v19 = vsub.f32 %v1708_v48, %v1724_v6 }
 0x2ad   :  { %v1664_v50 = vmul.f32 %v2036_v51, %v1663_v17  ;;  %v1670_v11 = vmul.f32 %v2038_v10, %v1518_v20  ;;  %vm1676_vm1 = vweird.f32 %v2038_v10 }
 0x2ae   :  { %1810 = vperm.xlu1 %2005, %v1692_v21   ;;  %vm1677_vm3 = vmor %vm1675_vm2, %vm1676_vm1  ;;  %v1868_v13 = vpop.permute.xlu2 %1867 }
 0x2af   :  { %v1668_v12 = vsel %vm1667_vm15, %v2036_v51, %v1664_v50  ;;  %v1671_v33 = vmul.f32 %v2038_v10, %v1670_v11 }
 0x2b0   :  { %v1693_v7 = vmul.f32 %v1668_v12, %v1501_v52 }
 0x2b1   :  { %v1672_v32 = vmul.f32 0.5, %v1671_v33 }
 0x2b2   :  { %1815 = vperm.xlu0 %2006, %v1693_v7   ;;  %v1725_v57 = vmul.f32 %v1693_v7, %v3767_v5 }
 0x2b3   :  { %v1673_v29 = vsub.f32 1.5, %v1672_v32 }
 0x2b4   :  { %v1741_v21 = vsub.f32 %v1709_v47, %v1725_v57 }
 0x2b5   :  { %v1674_v25 = vmul.f32 %v2038_v10, %v1673_v29 }
 0x2b6   :  { %v1858_v35 = vpop.permute.xlu1 %1857 }
 0x2b7   :  { %v1935_v51 = vadd.f32 %v1858_v35, %v1823_v9  ;;  %v1936_v18 = vadd.f32 %v1858_v35, %v1824_v56  ;;  %v1678_v61 = vsel %vm1677_vm3, %v2038_v10, %v1674_v25 }
 0x2b8   :  { %v1694_v37 = vmul.f32 %v1678_v61, %v1502_v16 }
 0x2b9   :  { %1967 = vst [vmem:[%s3959_s5] sm:$0xff] %v1935_v51 }
 0x2ba   :  { %1968 = vst.msk [vmem:[%s3959_s5 + $0x8] sm:$0xff] %vm1246_vm0, %v1936_v18  ;;  %1922 = vperm.xlu0 %2006, %v1740_v19   ;;  %v1751_v1 = vpop.permute.xlu0 %1750  ;;  %v1726_v20 = vmul.f32 %v1694_v37, %v3781_v42  ;;  %1820 = vperm.xlu2 %2004, %v1694_v37  }
 0x2bb   :  { %v1825_v24 = vmul.f32 %v1751_v1, %v3433_v3  ;;  %v1826_v17 = vmul.f32 %v1751_v1, %v3436_v4  ;;  %v1761_v3 = vpop.permute.xlu2 %1760 }
 0x2bc   :  { %v1742_v44 = vsub.f32 %v1710_v45, %v1726_v20  ;;  %v1829_v4 = vmul.f32 %v1761_v3, %v3468_v62 }
 0x2be   :  { %1932 = vperm.xlu1 %2005, %v1742_v44  }
 0x2c2   :  { %v1756_v10 = vpop.permute.xlu1 %1755  ;;  %v1863_v52 = vpop.permute.xlu0 %1862  ;;  %1927 = vperm.xlu2 %2004, %v1741_v21  }
 0x2c3   :  { %v1827_v50 = vmul.f32 %v1756_v10, %v3449_v58  ;;  %v1828_v42 = vmul.f32 %v1756_v10, %v3452_v60  ;;  %v1937_v11 = vadd.f32 %v1863_v52, %v1825_v24  ;;  %v1938_v5 = vadd.f32 %v1863_v52, %v1826_v17  ;;  %v1766_v60 = vpop.permute.xlu2 %1765 }
 0x2c4   :  { %v1830_v58 = vmul.f32 %v1761_v3, %v3465_v8  ;;  %v1831_v6 = vmul.f32 %v1766_v60, %v3482_v0  ;;  %v1832_v29 = vmul.f32 %v1766_v60, %v3478_v39 }
 0x2c5   :  { %v1939_v12 = vadd.f32 %v1868_v13, %v1827_v50  ;;  %v1940_v33 = vadd.f32 %v1868_v13, %v1828_v42  ;;  %1969 = vst [vmem:[%s3959_s5 + $0x10] sm:$0xff] %v1937_v11 }
 0x2c6   :  { %1970 = vst.msk [vmem:[%s3959_s5 + $0x18] sm:$0xff] %vm1246_vm0, %v1938_v5 }
 0x2c7   :  { %1971 = vst [vmem:[%s3959_s5 + $0x20] sm:$0xff] %v1939_v12 }
 0x2c8   :  { %1972 = vst.msk [vmem:[%s3959_s5 + $0x28] sm:$0xff] %vm1246_vm0, %v1940_v33 }
 0x2ce   :  { %v1883_v62 = vpop.permute.xlu2 %1882 }
 0x2d4   :  { %v1873_v7 = vpop.permute.xlu1 %1872 }
 0x2d5   :  { %v1941_v63 = vadd.f32 %v1873_v7, %v1829_v4  ;;  %v1942_v32 = vadd.f32 %v1873_v7, %v1830_v58 }
 0x2d6   :  { %v1776_v35 = vpop.permute.xlu2 %1775 }
 0x2d7   :  { %1973 = vst [vmem:[%s3959_s5 + $0x30] sm:$0xff] %v1941_v63  ;;  %v1835_v51 = vmul.f32 %v1776_v35, %v3510_v28  ;;  %v1836_v18 = vmul.f32 %v1776_v35, %v3513_v31 }
 0x2d8   :  { %1974 = vst.msk [vmem:[%s3959_s5 + $0x38] sm:$0xff] %vm1246_vm0, %v1942_v32 }
 0x2dc   :  { %v1878_v9 = vpop.permute.xlu0 %1877 }
 0x2dd   :  { %v1943_v8 = vadd.f32 %v1878_v9, %v1831_v6  ;;  %v1944_v56 = vadd.f32 %v1878_v9, %v1832_v29 }
 0x2df   :  { %1975 = vst [vmem:[%s3959_s5 + $0x40] sm:$0xff] %v1943_v8 }
 0x2e0   :  { %1976 = vst.msk [vmem:[%s3959_s5 + $0x48] sm:$0xff] %vm1246_vm0, %v1944_v56  ;;  %v1898_v1 = vpop.permute.xlu2 %1897 }
 0x2e2   :  { %v1771_v48 = vpop.permute.xlu1 %1770 }
 0x2e3   :  { %v1833_v16 = vmul.f32 %v1771_v48, %v3494_v54  ;;  %v1834_v0 = vmul.f32 %v1771_v48, %v3497_v53 }
 0x2e5   :  { %v1945_v25 = vadd.f32 %v1883_v62, %v1833_v16  ;;  %v1946_v39 = vadd.f32 %v1883_v62, %v1834_v0 }
 0x2e7   :  { %1977 = vst [vmem:[%s3959_s5 + $0x50] sm:$0xff] %v1945_v25 }
 0x2e8   :  { %1978 = vst.msk [vmem:[%s3959_s5 + $0x58] sm:$0xff] %vm1246_vm0, %v1946_v39  ;;  %v1791_v24 = vpop.permute.xlu2 %1790 }
 0x2e9   :  { %v1842_v17 = vmul.f32 %v1791_v24, %v3554_v14 }
 0x2ea   :  { %v1888_v61 = vpop.permute.xlu1 %1887 }
 0x2eb   :  { %v1947_v54 = vadd.f32 %v1888_v61, %v1835_v51  ;;  %v1948_v19 = vadd.f32 %v1888_v61, %v1836_v18 }
 0x2ed   :  { %1979 = vst [vmem:[%s3959_s5 + $0x60] sm:$0xff] %v1947_v54 }
 0x2ee   :  { %1980 = vst.msk [vmem:[%s3959_s5 + $0x68] sm:$0xff] %vm1246_vm0, %v1948_v19 }
 0x2f0   :  { %v1893_v53 = vpop.permute.xlu0 %1892 }
 0x2f2   :  { %v1781_v37 = vpop.permute.xlu1 %1780 }
 0x2f3   :  { %v1837_v45 = vmul.f32 %v1781_v37, %v3529_v15  ;;  %v1838_v28 = vmul.f32 %v1781_v37, %v3532_v22  ;;  %v1841_v22 = vmul.f32 %v1791_v24, %v3352_v55 }
 0x2f5   :  { %v1949_v31 = vadd.f32 %v1893_v53, %v1837_v45  ;;  %v1950_v20 = vadd.f32 %v1893_v53, %v1838_v28 }
 0x2f7   :  { %1981 = vst [vmem:[%s3959_s5 + $0x70] sm:$0xff] %v1949_v31 }
 0x2f8   :  { %1982 = vst.msk [vmem:[%s3959_s5 + $0x78] sm:$0xff] %vm1246_vm0, %v1950_v20  ;;  %v1786_v44 = vpop.permute.xlu0 %1785  ;;  %v1913_v50 = vpop.permute.xlu2 %1912 }
 0x2f9   :  { %v1839_v57 = vmul.f32 %v1786_v44, %v3343_v38  ;;  %v1840_v47 = vmul.f32 %v1786_v44, %v3543_v41 }
 0x2fb   :  { %v1951_v13 = vadd.f32 %v1898_v1, %v1839_v57  ;;  %v1952_v15 = vadd.f32 %v1898_v1, %v1840_v47 }
 0x2fd   :  { %1983 = vst [vmem:[%s3959_s5 + $0x80] sm:$0xff] %v1951_v13 }
 0x2fe   :  { %1984 = vst.msk [vmem:[%s3959_s5 + $0x88] sm:$0xff] %vm1246_vm0, %v1952_v15 }
 0x300   :  { %v1903_v21 = vpop.permute.xlu1 %1902  ;;  %v1806_v4 = vpop.permute.xlu2 %1805 }
 0x301   :  { %v1953_v38 = vadd.f32 %v1903_v21, %v1841_v22  ;;  %v1954_v10 = vadd.f32 %v1903_v21, %v1842_v17  ;;  %v1848_v58 = vmul.f32 %v1806_v4, %v3587_v46 }
 0x303   :  { %1985 = vst [vmem:[%s3959_s5 + $0x90] sm:$0xff] %v1953_v38 }
 0x304   :  { %1986 = vst.msk [vmem:[%s3959_s5 + $0x98] sm:$0xff] %vm1246_vm0, %v1954_v10 }
 0x308   :  { %v1908_v41 = vpop.permute.xlu0 %1907  ;;  %v1796_v52 = vpop.permute.xlu1 %1795 }
 0x309   :  { %v1843_v42 = vmul.f32 %v1796_v52, %v3361_v36  ;;  %v1844_v55 = vmul.f32 %v1796_v52, %v3565_v27  ;;  %v1847_v27 = vmul.f32 %v1806_v4, %v3379_v40 }
 0x30b   :  { %v1955_v14 = vadd.f32 %v1908_v41, %v1843_v42  ;;  %v1956_v11 = vadd.f32 %v1908_v41, %v1844_v55 }
 0x30d   :  { %1987 = vst [vmem:[%s3959_s5 + $0xa0] sm:$0xff] %v1955_v14 }
 0x30e   :  { %1988 = vst.msk [vmem:[%s3959_s5 + $0xa8] sm:$0xff] %vm1246_vm0, %v1956_v11 }
 0x310   :  { %v1801_v5 = vpop.permute.xlu0 %1800 }
 0x311   :  { %v1845_v12 = vmul.f32 %v1801_v5, %v3370_v34  ;;  %v1846_v33 = vmul.f32 %v1801_v5, %v3576_v49 }
 0x313   :  { %v1957_v3 = vadd.f32 %v1913_v50, %v1845_v12  ;;  %v1958_v36 = vadd.f32 %v1913_v50, %v1846_v33 }
 0x314   :  { %v1821_v49 = vpop.permute.xlu2 %1820 }
 0x315   :  { %1989 = vst [vmem:[%s3959_s5 + $0xb0] sm:$0xff] %v1957_v3  ;;  %v1853_v48 = vmul.f32 %v1821_v49, %v3406_v30  ;;  %v1854_v16 = vmul.f32 %v1821_v49, %v3619_v26 }
 0x316   :  { %1990 = vst.msk [vmem:[%s3959_s5 + $0xb8] sm:$0xff] %vm1246_vm0, %v1958_v36 }
 0x318   :  { %v1918_v60 = vpop.permute.xlu1 %1917 }
 0x319   :  { %v1959_v34 = vadd.f32 %v1918_v60, %v1847_v27  ;;  %v1960_v7 = vadd.f32 %v1918_v60, %v1848_v58 }
 0x31b   :  { %1991 = vst [vmem:[%s3959_s5 + $0xc0] sm:$0xff] %v1959_v34 }
 0x31c   :  { %1992 = vst.msk [vmem:[%s3959_s5 + $0xc8] sm:$0xff] %vm1246_vm0, %v1960_v7  ;;  %v1928_v6 = vpop.permute.xlu2 %1927 }
 0x320   :  { %v1811_v62 = vpop.permute.xlu1 %1810 }
 0x321   :  { %v1849_v9 = vmul.f32 %v1811_v62, %v3388_v2  ;;  %v1850_v8 = vmul.f32 %v1811_v62, %v3598_v43 }
 0x324   :  { %v1816_v63 = vpop.permute.xlu0 %1815 }
 0x325   :  { %v1851_v32 = vmul.f32 %v1816_v63, %v3397_v59  ;;  %v1852_v40 = vmul.f32 %v1816_v63, %v3609_v23 }
 0x327   :  { %v1963_v46 = vadd.f32 %v1928_v6, %v1851_v32  ;;  %v1964_v29 = vadd.f32 %v1928_v6, %v1852_v40 }
 0x329   :  { %1995 = vst [vmem:[%s3959_s5 + $0xe0] sm:$0xff] %v1963_v46 }
 0x32a   :  { %1996 = vst.msk [vmem:[%s3959_s5 + $0xe8] sm:$0xff] %vm1246_vm0, %v1964_v29 }
 0x32c   :  { %v1923_v59 = vpop.permute.xlu0 %1922 }
 0x32d   :  { %v1961_v56 = vadd.f32 %v1923_v59, %v1849_v9  ;;  %v1962_v23 = vadd.f32 %v1923_v59, %v1850_v8 }
 0x32f   :  { %1993 = vst [vmem:[%s3959_s5 + $0xd0] sm:$0xff] %v1961_v56 }
 0x330   :  { %1994 = vst.msk [vmem:[%s3959_s5 + $0xd8] sm:$0xff] %vm1246_vm0, %v1962_v23  ;;  %v1933_v0 = vpop.permute.xlu1 %1932 }
 0x331   :  { %v1965_v2 = vadd.f32 %v1933_v0, %v1853_v48  ;;  %v1966_v25 = vadd.f32 %v1933_v0, %v1854_v16 }
 0x333   :  { %1997 = vst [vmem:[%s3959_s5 + $0xf0] sm:$0xff] %v1965_v2 }
 0x334   :  { %1998 = vst.msk [vmem:[%s3959_s5 + $0xf8] sm:$0xff] %vm1246_vm0, %v1966_v25 }

</bundles_post_ra>
